<compile_context>
chip_gen: v7x
topology: tpu7x:2x2x1
jax: 0.10.0
libtpu: 0.0.40
codegen_flags: <defaults>
</compile_context>

<pallas_src>
import functools

import jax
import jax.numpy as jnp
import numpy as np
from jax.experimental import pallas as pl
from jax.experimental.pallas import tpu as pltpu

_LANE = 128
_SMALL_VERTS_BYTES = 1 << 20          # <= 1 MiB of vertices -> single-step fast path


def _round_up(x, m):
    return ((x + m - 1) // m) * m


def _budgets():
    """(per-tile working-set budget, scoped-VMEM cap), generation-aware."""
    try:
        cap = int(pltpu.get_tpu_info().vmem_capacity_bytes)
    except Exception:
        cap = 0
    if cap >= (96 << 20):              # v5e / v6e: 128 MiB physical VMEM
        return 28 << 20, 64 << 20
    return 16 << 20, 40 << 20          # v7x (64 MiB) or unknown: conservative


def _vmem_limit_bytes(working_set_bytes, limit_cap):
    # >= working set + headroom, capped below the generation's physical VMEM.
    return int(min(max(working_set_bytes + (2 << 20), 16 << 20), limit_cap))


# ----------------------------------------------------------------------------
# Kernel 1: rigid vertex transform.
#   verts laid out (n_obj, 3, V_rows, 128); rt (n_obj*12,) packed [R(9)|t(3)] in SMEM.
# ----------------------------------------------------------------------------
def _vert_transform_tiled_kernel(rt_ref, v_ref, o_ref):
    o = pl.program_id(0)
    b = o * 12
    r00 = rt_ref[b + 0]; r01 = rt_ref[b + 1]; r02 = rt_ref[b + 2]
    r10 = rt_ref[b + 3]; r11 = rt_ref[b + 4]; r12 = rt_ref[b + 5]
    r20 = rt_ref[b + 6]; r21 = rt_ref[b + 7]; r22 = rt_ref[b + 8]
    tx = rt_ref[b + 9]; ty = rt_ref[b + 10]; tz = rt_ref[b + 11]

    x = v_ref[0]                      # (rows_tile, 128) dense slab
    y = v_ref[1]
    z = v_ref[2]
    o_ref[0] = r00 * x + r01 * y + r02 * z + tx   # whole-slab unmasked stores
    o_ref[1] = r10 * x + r11 * y + r12 * z + ty
    o_ref[2] = r20 * x + r21 * y + r22 * z + tz


def _vert_transform_small_kernel(rt_ref, v_ref, o_ref, *, n_obj):
    # Single grid step over the whole array; n_obj is small & static -> unrolled.
    for o in range(n_obj):
        b = o * 12
        r00 = rt_ref[b + 0]; r01 = rt_ref[b + 1]; r02 = rt_ref[b + 2]
        r10 = rt_ref[b + 3]; r11 = rt_ref[b + 4]; r12 = rt_ref[b + 5]
        r20 = rt_ref[b + 6]; r21 = rt_ref[b + 7]; r22 = rt_ref[b + 8]
        tx = rt_ref[b + 9]; ty = rt_ref[b + 10]; tz = rt_ref[b + 11]
        x = v_ref[o, 0]
        y = v_ref[o, 1]
        z = v_ref[o, 2]
        o_ref[o, 0] = r00 * x + r01 * y + r02 * z + tx
        o_ref[o, 1] = r10 * x + r11 * y + r12 * z + ty
        o_ref[o, 2] = r20 * x + r21 * y + r22 * z + tz


def _pick_rows_tile(v_rows, budget_bytes):
    # double-buffered input + output, 3 coordinate planes, f32
    per_row = 2 * 2 * 3 * _LANE * 4
    # exclude the full-v_rows candidate so the per-object grid keeps >= 2 steps
    # (lets both v7x TensorCores work even for n_obj == 1)
    cands = [r for r in range(8, v_rows, 8)
             if v_rows % r == 0 and r * per_row <= budget_bytes]
    if cands:
        return max(cands)
    return v_rows                       # full-dim block is always legal


def transform_vertices(R, t, verts):
    """R: (n_obj,3,3) f32, t: (n_obj,3) f32, verts: (n_obj,3,V_pad) f32, V_pad % 128 == 0."""
    n_obj, _, v_pad = verts.shape
    assert v_pad % _LANE == 0, "pad per-mesh vertex count to a multiple of 128"
    v_rows = v_pad // _LANE
    verts4 = verts.astype(jnp.float32).reshape(n_obj, 3, v_rows, _LANE)  # free reshape
    rt = jnp.concatenate([R.reshape(n_obj, 9), t.reshape(n_obj, 3)], axis=1)
    rt = rt.reshape(n_obj * 12).astype(jnp.float32)          # 1-D SMEM: no 2-D padding

    tile_budget, limit_cap = _budgets()
    total_bytes = n_obj * 3 * v_pad * 4

    if total_bytes <= _SMALL_VERTS_BYTES:
        # Fast path: one grid step, unrolled objects (per-step overhead dominates here).
        kern = functools.partial(_vert_transform_small_kernel, n_obj=n_obj)
        out4 = pl.pallas_call(
            kern,
            out_shape=jax.ShapeDtypeStruct(verts4.shape, jnp.float32),
            grid_spec=pl.GridSpec(
                grid=(1,),
                in_specs=[
                    pl.BlockSpec(memory_space=pltpu.MemorySpace.SMEM),     # rt
                    pl.BlockSpec((n_obj, 3, v_rows, _LANE),
                                 lambda i: (0, 0, 0, 0)),                  # verts
                ],
                out_specs=pl.BlockSpec((n_obj, 3, v_rows, _LANE),
                                       lambda i: (0, 0, 0, 0)),
            ),
            compiler_params=pltpu.CompilerParams(
                dimension_semantics=("arbitrary",),
                vmem_limit_bytes=_vmem_limit_bytes(4 * total_bytes, limit_cap)),
        )(rt, verts4)
        return out4.reshape(n_obj, 3, v_pad)

    rows_tile = _pick_rows_tile(v_rows, tile_budget)
    vmem = 2 * 2 * 3 * rows_tile * _LANE * 4
    out4 = pl.pallas_call(
        _vert_transform_tiled_kernel,
        out_shape=jax.ShapeDtypeStruct(verts4.shape, jnp.float32),
        grid_spec=pl.GridSpec(
            grid=(n_obj, pl.cdiv(v_rows, rows_tile)),
            in_specs=[
                pl.BlockSpec(memory_space=pltpu.MemorySpace.SMEM),         # rt (n_obj*12,)
                pl.BlockSpec((None, 3, rows_tile, _LANE),
                             lambda o, r: (o, 0, r, 0)),                   # verts
            ],
            out_specs=pl.BlockSpec((None, 3, rows_tile, _LANE),
                                   lambda o, r: (o, 0, r, 0)),
        ),
        compiler_params=pltpu.CompilerParams(
            dimension_semantics=("parallel", "parallel"),
            vmem_limit_bytes=_vmem_limit_bytes(vmem, limit_cap)),
    )(rt, verts4)
    return out4.reshape(n_obj, 3, v_pad)


# ----------------------------------------------------------------------------
# Kernel 2: fragment post-processing.
#   image_depth = where(zbuf >= 0, zbuf, max_depth).min(over K); sentinel -> 0
#   obj_mask[i] = (pix_to_face >= faces_num[i]) & (pix_to_face < faces_num[i+1])  (int8)
# ----------------------------------------------------------------------------
def _depth_mask_kernel(faces_ref, zbuf_ref, pix_ref, depth_ref, mask_ref,
                       *, max_depth, n_obj, k_faces):
    # Slab-at-a-time K reduction: only one (h_tile, W) f32 value stays live, so no
    # (K, h_tile, W) `where` temporary inflating VMEM/vreg pressure.
    z0 = zbuf_ref[0]
    acc = jnp.where(z0 >= 0.0, z0, max_depth)
    for k in range(1, k_faces):
        zk = zbuf_ref[k]
        acc = jnp.minimum(acc, jnp.where(zk >= 0.0, zk, max_depth))
    # Exact-equality sentinel test intentionally mirrors the torch reference semantics.
    depth_ref[...] = jnp.where(acc != max_depth, acc, 0.0)

    pix = pix_ref[...]                             # (h_tile, W) int32
    # Boundaries are monotone cumulative face counts: mask_i = ge_i & ~ge_{i+1}
    # (one compare per boundary instead of two per object).
    ge_prev = pix >= faces_ref[0]
    for i in range(n_obj):                         # n_obj small & static -> unrolled
        ge_next = pix >= faces_ref[i + 1]
        mask_ref[i] = (ge_prev & jnp.logical_not(ge_next)).astype(jnp.int8)
        ge_prev = ge_next


def _pick_h_tile(K, H, W, n_obj, budget_bytes):
    if H <= 32:
        return H                                   # single full-dim block (always legal)
    # double-buffered zbuf (K f32 slabs) + pix (i32) + depth (f32) + n_obj int8 masks,
    # plus ~4 live (h,W) f32 temporaries from the slab-at-a-time reduction / masks.
    per_row = 2 * ((K + 2) * W * 4 + n_obj * W) + 4 * W * 4
    h_budget = max(32, (budget_bytes // per_row) // 32 * 32)
    # keep >= 2 grid steps so both v7x TensorCores get work
    h_half = max(32, _round_up((H + 1) // 2, 32))
    return int(min(h_budget, h_half))


def depth_and_masks(zbuf_khw, pix_hw, faces_num, *, max_depth=4.0):
    """zbuf_khw: (K,H,W) f32, pix_hw: (H,W) i32, faces_num: (n_obj+1,) i32."""
    K, H, W = zbuf_khw.shape
    n_obj = int(faces_num.shape[0]) - 1

    # Lane-dense stores: pad W to a multiple of 128 when needed (no-op if aligned).
    W_pad = _round_up(W, _LANE)
    if W_pad != W:
        zbuf_khw = jnp.pad(zbuf_khw, ((0, 0), (0, 0), (0, W_pad - W)),
                           constant_values=-1.0)
        pix_hw = jnp.pad(pix_hw, ((0, 0), (0, W_pad - W)), constant_values=-1)

    tile_budget, limit_cap = _budgets()
    h_tile = _pick_h_tile(K, H, W_pad, n_obj, tile_budget)
    grid_h = pl.cdiv(H, h_tile)                    # ragged last block handled by Pallas

    kern = functools.partial(_depth_mask_kernel, max_depth=float(max_depth),
                             n_obj=n_obj, k_faces=K)
    vmem = 2 * h_tile * ((K + 2) * W_pad * 4 + n_obj * W_pad) + 4 * h_tile * W_pad * 4
    depth, masks = pl.pallas_call(
        kern,
        out_shape=(jax.ShapeDtypeStruct((H, W_pad), jnp.float32),
                   jax.ShapeDtypeStruct((n_obj, H, W_pad), jnp.int8)),
        grid_spec=pl.GridSpec(
            grid=(grid_h,),
            in_specs=[
                pl.BlockSpec(memory_space=pltpu.MemorySpace.SMEM),         # faces_num
                pl.BlockSpec((K, h_tile, W_pad), lambda h: (0, h, 0)),     # zbuf
                pl.BlockSpec((h_tile, W_pad), lambda h: (h, 0)),           # pix_to_face
            ],
            out_specs=(
                pl.BlockSpec((h_tile, W_pad), lambda h: (h, 0)),           # depth
                pl.BlockSpec((n_obj, h_tile, W_pad), lambda h: (0, h, 0)), # masks (int8)
            ),
        ),
        compiler_params=pltpu.CompilerParams(
            dimension_semantics=("parallel",),
            vmem_limit_bytes=_vmem_limit_bytes(vmem, limit_cap)),
    )(faces_num, zbuf_khw, pix_hw)
    if W_pad != W:
        depth = depth[:, :W]
        masks = masks[:, :, :W]
    return depth, masks


# ----------------------------------------------------------------------------
# JAX-side "Renderer" glue mirroring the PyTorch module (representation == 'q').
# ----------------------------------------------------------------------------
def _quaternion_to_matrix(q):
    # pytorch3d.transforms.quaternion_to_matrix convention, q = (w, x, y, z)
    w, x, y, z = q[:, 0], q[:, 1], q[:, 2], q[:, 3]
    s = 2.0 / jnp.sum(q * q, axis=-1)
    return jnp.stack([
        jnp.stack([1 - s * (y * y + z * z), s * (x * y - z * w), s * (x * z + y * w)], -1),
        jnp.stack([s * (x * y + z * w), 1 - s * (x * x + z * z), s * (y * z - x * w)], -1),
        jnp.stack([s * (x * z - y * w), s * (y * z + x * w), 1 - s * (x * x + y * y)], -1),
    ], axis=-2)


@functools.partial(jax.jit, static_argnames=("max_depth",))
def _forward_impl(q, t, verts, zbuf, pix, faces_num, max_depth):
    # Single jit so XLA dispatches/overlaps both pallas_calls together.
    R = _quaternion_to_matrix(q)           # tiny scalar math, hoisted out of the Pallas grid
    verts_tf = transform_vertices(R, t, verts)
    depth, masks = depth_and_masks(zbuf, pix, faces_num, max_depth=max_depth)
    return verts_tf, depth, masks


class Renderer:
    def __init__(self, verts_list, faces_count_list, q_list, t_list, faces_per_pixel=8):
        # verts_list: (n_obj, 3, V_pad); pose parameters q_list (n_obj,4), t_list (n_obj,3)
        self.verts = verts_list
        self.q_list = q_list
        self.t_list = t_list
        self.faces_per_pixel = faces_per_pixel
        # cumulative face counts (meshes_faces_num in the torch forward)
        self.meshes_faces_num = jnp.asarray(
            np.concatenate([[0], np.cumsum(np.asarray(faces_count_list))]),
            dtype=jnp.int32)

    def forward(self, zbuf, pix_to_face, max_scene_depth=4.0):
        # TODO(synk): PyTorch3D MeshRasterizer + SoftGouraudShader (self.ren_opt) have no
        # Pallas equivalent; fragments (zbuf, pix_to_face) are inputs and image_est is None.
        image_est = None
        verts_tf, image_depth_est, obj_masks = _forward_impl(
            self.q_list, self.t_list, self.verts, zbuf, pix_to_face,
            self.meshes_faces_num, float(max_scene_depth))
        # obj_masks are int8 0/1 planes emitted in-kernel (boolean semantics preserved).
        fragments_est = (zbuf, pix_to_face)
        return image_est, image_depth_est, obj_masks, fragments_est, verts_tf


# ----------------------------------------------------------------------------
# Pure-JAX reference for sanity checking.
# ----------------------------------------------------------------------------
def _reference(q, t, verts, zbuf, pix, faces_num, max_depth):
    R = _quaternion_to_matrix(q)
    verts_ref = jnp.einsum("oij,ojv->oiv", R, verts) + t[:, :, None]
    d = jnp.where(zbuf >= 0.0, zbuf, max_depth).min(axis=0)
    depth_ref = jnp.where(d != max_depth, d, 0.0)
    masks_ref = jnp.stack(
        [(pix >= faces_num[i]) & (pix < faces_num[i + 1])
         for i in range(faces_num.shape[0] - 1)], axis=0)
    return verts_ref, depth_ref, masks_ref


if __name__ == "__main__":
    key = jax.random.PRNGKey(0)
    k1, k2, k3, k4, k5, k6 = jax.random.split(key, 6)

    n_obj = 2            # number of scene objects
    v_pad = 1024         # padded vertex count per mesh (multiple of 128 lanes)
    H, W = 64, 256       # render resolution (W on the lane axis)
    K = 8                # faces_per_pixel
    max_scene_depth = 4.0

    # deterministic synthetic meshes & pose parameters (module's __init__/init_repr)
    verts = jax.random.uniform(k1, (n_obj, 3, v_pad), jnp.float32, -0.5, 0.5)
    q_list = jax.random.normal(k2, (n_obj, 4), jnp.float32) + jnp.array([2.0, 0, 0, 0])
    t_list = jax.random.uniform(k3, (n_obj, 3), jnp.float32, -0.2, 0.2) \
        + jnp.array([0.0, 0.0, 1.5])
    faces_count_list = [300, 350]

    # deterministic synthetic fragments (stand-in for the PyTorch3D rasterizer output)
    z_raw = jax.random.uniform(k4, (K, H, W), jnp.float32, 0.5, 3.5)
    hit = jax.random.bernoulli(k5, 0.7, (K, H, W))
    zbuf = jnp.where(hit, z_raw, -1.0)                       # -1 == empty, like pytorch3d
    pix_to_face = jax.random.randint(k6, (H, W), -1, 650, jnp.int32)

    ren = Renderer(verts, faces_count_list, q_list, t_list, faces_per_pixel=K)
    image_est, image_depth_est, obj_masks, fragments_est, verts_tf = ren.forward(
        zbuf, pix_to_face, max_scene_depth=max_scene_depth)

    jax.block_until_ready((image_depth_est, obj_masks, verts_tf))

    # sanity check against plain-JAX reference
    verts_ref, depth_ref, masks_ref = _reference(
        q_list, t_list, verts, zbuf, pix_to_face, ren.meshes_faces_num,
        max_scene_depth)
    assert np.allclose(np.asarray(verts_tf), np.asarray(verts_ref), atol=1e-5)
    assert np.allclose(np.asarray(image_depth_est), np.asarray(depth_ref), atol=1e-6)
    assert np.array_equal(np.asarray(obj_masks) != 0, np.asarray(masks_ref))

    print("KERNEL_OK")
</pallas_src>

<mosaic_0001>
module attributes {stable_mosaic.version = 11 : i64} {
  func.func @_vert_transform_small_kernel(%arg0: i32, %arg1: memref<24xf32, #tpu.memory_space<smem>>, %arg2: memref<2x3x8x128xf32, #tpu.memory_space<vmem>>, %arg3: memref<2x3x8x128xf32, #tpu.memory_space<vmem>>) attributes {dimension_semantics = [#tpu.dimension_semantics<arbitrary>], iteration_bounds = array<i64: 1>, scalar_prefetch = 0 : i64, scratch_operands = 0 : i64, tpu.core_type = #tpu.core_type<tc>, window_params = [{transform_indices = @transform_0, window_bounds = array<i64: 24>}, {pipeline_mode = #tpu.pipeline_mode<synchronous>, transform_indices = @transform_1, window_bounds = array<i64: 2, 3, 8, 128>}, {pipeline_mode = #tpu.pipeline_mode<synchronous>, transform_indices = @transform_2, window_bounds = array<i64: 2, 3, 8, 128>}]} {
    %c0 = arith.constant 0 : index
    %0 = memref.load %arg1[%c0] : memref<24xf32, #tpu.memory_space<smem>>
    %c1 = arith.constant 1 : index
    %1 = memref.load %arg1[%c1] : memref<24xf32, #tpu.memory_space<smem>>
    %c2 = arith.constant 2 : index
    %2 = memref.load %arg1[%c2] : memref<24xf32, #tpu.memory_space<smem>>
    %c3 = arith.constant 3 : index
    %3 = memref.load %arg1[%c3] : memref<24xf32, #tpu.memory_space<smem>>
    %c4 = arith.constant 4 : index
    %4 = memref.load %arg1[%c4] : memref<24xf32, #tpu.memory_space<smem>>
    %c5 = arith.constant 5 : index
    %5 = memref.load %arg1[%c5] : memref<24xf32, #tpu.memory_space<smem>>
    %c6 = arith.constant 6 : index
    %6 = memref.load %arg1[%c6] : memref<24xf32, #tpu.memory_space<smem>>
    %c7 = arith.constant 7 : index
    %7 = memref.load %arg1[%c7] : memref<24xf32, #tpu.memory_space<smem>>
    %c8 = arith.constant 8 : index
    %8 = memref.load %arg1[%c8] : memref<24xf32, #tpu.memory_space<smem>>
    %c9 = arith.constant 9 : index
    %9 = memref.load %arg1[%c9] : memref<24xf32, #tpu.memory_space<smem>>
    %c10 = arith.constant 10 : index
    %10 = memref.load %arg1[%c10] : memref<24xf32, #tpu.memory_space<smem>>
    %c11 = arith.constant 11 : index
    %11 = memref.load %arg1[%c11] : memref<24xf32, #tpu.memory_space<smem>>
    %c0_0 = arith.constant 0 : index
    %c0_1 = arith.constant 0 : index
    %c0_2 = arith.constant 0 : index
    %c0_3 = arith.constant 0 : index
    %12 = vector.load %arg2[%c0_0, %c0_1, %c0_2, %c0_3] : memref<2x3x8x128xf32, #tpu.memory_space<vmem>>, vector<1x1x8x128xf32>
    %13 = vector.shape_cast %12 : vector<1x1x8x128xf32> to vector<8x128xf32>
    %c0_4 = arith.constant 0 : index
    %c1_5 = arith.constant 1 : index
    %c0_6 = arith.constant 0 : index
    %c0_7 = arith.constant 0 : index
    %14 = vector.load %arg2[%c0_4, %c1_5, %c0_6, %c0_7] : memref<2x3x8x128xf32, #tpu.memory_space<vmem>>, vector<1x1x8x128xf32>
    %15 = vector.shape_cast %14 : vector<1x1x8x128xf32> to vector<8x128xf32>
    %c0_8 = arith.constant 0 : index
    %c2_9 = arith.constant 2 : index
    %c0_10 = arith.constant 0 : index
    %c0_11 = arith.constant 0 : index
    %16 = vector.load %arg2[%c0_8, %c2_9, %c0_10, %c0_11] : memref<2x3x8x128xf32, #tpu.memory_space<vmem>>, vector<1x1x8x128xf32>
    %17 = vector.shape_cast %16 : vector<1x1x8x128xf32> to vector<8x128xf32>
    %18 = vector.broadcast %0 : f32 to vector<8x128xf32>
    %19 = arith.mulf %18, %13 : vector<8x128xf32>
    %20 = vector.broadcast %1 : f32 to vector<8x128xf32>
    %21 = arith.mulf %20, %15 : vector<8x128xf32>
    %22 = arith.addf %19, %21 : vector<8x128xf32>
    %23 = vector.broadcast %2 : f32 to vector<8x128xf32>
    %24 = arith.mulf %23, %17 : vector<8x128xf32>
    %25 = arith.addf %22, %24 : vector<8x128xf32>
    %26 = vector.broadcast %9 : f32 to vector<8x128xf32>
    %27 = arith.addf %25, %26 : vector<8x128xf32>
    %c0_12 = arith.constant 0 : index
    %c0_13 = arith.constant 0 : index
    %c0_14 = arith.constant 0 : index
    %c0_15 = arith.constant 0 : index
    %28 = vector.load %arg3[%c0_12, %c0_13, %c0_14, %c0_15] : memref<2x3x8x128xf32, #tpu.memory_space<vmem>>, vector<1x1x8x128xf32>
    %29 = vector.shape_cast %28 : vector<1x1x8x128xf32> to vector<8x128xf32>
    %30 = vector.shape_cast %27 : vector<8x128xf32> to vector<1x1x8x128xf32>
    tpu.vector_store %arg3[%c0_12, %c0_13, %c0_14, %c0_15], %30 {strides = array<i32>} : memref<2x3x8x128xf32, #tpu.memory_space<vmem>>, vector<1x1x8x128xf32>,
    %31 = vector.broadcast %3 : f32 to vector<8x128xf32>
    %32 = arith.mulf %31, %13 : vector<8x128xf32>
    %33 = vector.broadcast %4 : f32 to vector<8x128xf32>
    %34 = arith.mulf %33, %15 : vector<8x128xf32>
    %35 = arith.addf %32, %34 : vector<8x128xf32>
    %36 = vector.broadcast %5 : f32 to vector<8x128xf32>
    %37 = arith.mulf %36, %17 : vector<8x128xf32>
    %38 = arith.addf %35, %37 : vector<8x128xf32>
    %39 = vector.broadcast %10 : f32 to vector<8x128xf32>
    %40 = arith.addf %38, %39 : vector<8x128xf32>
    %c0_16 = arith.constant 0 : index
    %c1_17 = arith.constant 1 : index
    %c0_18 = arith.constant 0 : index
    %c0_19 = arith.constant 0 : index
    %41 = vector.load %arg3[%c0_16, %c1_17, %c0_18, %c0_19] : memref<2x3x8x128xf32, #tpu.memory_space<vmem>>, vector<1x1x8x128xf32>
    %42 = vector.shape_cast %41 : vector<1x1x8x128xf32> to vector<8x128xf32>
    %43 = vector.shape_cast %40 : vector<8x128xf32> to vector<1x1x8x128xf32>
    tpu.vector_store %arg3[%c0_16, %c1_17, %c0_18, %c0_19], %43 {strides = array<i32>} : memref<2x3x8x128xf32, #tpu.memory_space<vmem>>, vector<1x1x8x128xf32>,
    %44 = vector.broadcast %6 : f32 to vector<8x128xf32>
    %45 = arith.mulf %44, %13 : vector<8x128xf32>
    %46 = vector.broadcast %7 : f32 to vector<8x128xf32>
    %47 = arith.mulf %46, %15 : vector<8x128xf32>
    %48 = arith.addf %45, %47 : vector<8x128xf32>
    %49 = vector.broadcast %8 : f32 to vector<8x128xf32>
    %50 = arith.mulf %49, %17 : vector<8x128xf32>
    %51 = arith.addf %48, %50 : vector<8x128xf32>
    %52 = vector.broadcast %11 : f32 to vector<8x128xf32>
    %53 = arith.addf %51, %52 : vector<8x128xf32>
    %c0_20 = arith.constant 0 : index
    %c2_21 = arith.constant 2 : index
    %c0_22 = arith.constant 0 : index
    %c0_23 = arith.constant 0 : index
    %54 = vector.load %arg3[%c0_20, %c2_21, %c0_22, %c0_23] : memref<2x3x8x128xf32, #tpu.memory_space<vmem>>, vector<1x1x8x128xf32>
    %55 = vector.shape_cast %54 : vector<1x1x8x128xf32> to vector<8x128xf32>
    %56 = vector.shape_cast %53 : vector<8x128xf32> to vector<1x1x8x128xf32>
    tpu.vector_store %arg3[%c0_20, %c2_21, %c0_22, %c0_23], %56 {strides = array<i32>} : memref<2x3x8x128xf32, #tpu.memory_space<vmem>>, vector<1x1x8x128xf32>,
    %c12 = arith.constant 12 : index
    %57 = memref.load %arg1[%c12] : memref<24xf32, #tpu.memory_space<smem>>
    %c13 = arith.constant 13 : index
    %58 = memref.load %arg1[%c13] : memref<24xf32, #tpu.memory_space<smem>>
    %c14 = arith.constant 14 : index
    %59 = memref.load %arg1[%c14] : memref<24xf32, #tpu.memory_space<smem>>
    %c15 = arith.constant 15 : index
    %60 = memref.load %arg1[%c15] : memref<24xf32, #tpu.memory_space<smem>>
    %c16 = arith.constant 16 : index
    %61 = memref.load %arg1[%c16] : memref<24xf32, #tpu.memory_space<smem>>
    %c17 = arith.constant 17 : index
    %62 = memref.load %arg1[%c17] : memref<24xf32, #tpu.memory_space<smem>>
    %c18 = arith.constant 18 : index
    %63 = memref.load %arg1[%c18] : memref<24xf32, #tpu.memory_space<smem>>
    %c19 = arith.constant 19 : index
    %64 = memref.load %arg1[%c19] : memref<24xf32, #tpu.memory_space<smem>>
    %c20 = arith.constant 20 : index
    %65 = memref.load %arg1[%c20] : memref<24xf32, #tpu.memory_space<smem>>
    %c21 = arith.constant 21 : index
    %66 = memref.load %arg1[%c21] : memref<24xf32, #tpu.memory_space<smem>>
    %c22 = arith.constant 22 : index
    %67 = memref.load %arg1[%c22] : memref<24xf32, #tpu.memory_space<smem>>
    %c23 = arith.constant 23 : index
    %68 = memref.load %arg1[%c23] : memref<24xf32, #tpu.memory_space<smem>>
    %c1_24 = arith.constant 1 : index
    %c0_25 = arith.constant 0 : index
    %c0_26 = arith.constant 0 : index
    %c0_27 = arith.constant 0 : index
    %69 = vector.load %arg2[%c1_24, %c0_25, %c0_26, %c0_27] : memref<2x3x8x128xf32, #tpu.memory_space<vmem>>, vector<1x1x8x128xf32>
    %70 = vector.shape_cast %69 : vector<1x1x8x128xf32> to vector<8x128xf32>
    %c1_28 = arith.constant 1 : index
    %c1_29 = arith.constant 1 : index
    %c0_30 = arith.constant 0 : index
    %c0_31 = arith.constant 0 : index
    %71 = vector.load %arg2[%c1_28, %c1_29, %c0_30, %c0_31] : memref<2x3x8x128xf32, #tpu.memory_space<vmem>>, vector<1x1x8x128xf32>
    %72 = vector.shape_cast %71 : vector<1x1x8x128xf32> to vector<8x128xf32>
    %c1_32 = arith.constant 1 : index
    %c2_33 = arith.constant 2 : index
    %c0_34 = arith.constant 0 : index
    %c0_35 = arith.constant 0 : index
    %73 = vector.load %arg2[%c1_32, %c2_33, %c0_34, %c0_35] : memref<2x3x8x128xf32, #tpu.memory_space<vmem>>, vector<1x1x8x128xf32>
    %74 = vector.shape_cast %73 : vector<1x1x8x128xf32> to vector<8x128xf32>
    %75 = vector.broadcast %57 : f32 to vector<8x128xf32>
    %76 = arith.mulf %75, %70 : vector<8x128xf32>
    %77 = vector.broadcast %58 : f32 to vector<8x128xf32>
    %78 = arith.mulf %77, %72 : vector<8x128xf32>
    %79 = arith.addf %76, %78 : vector<8x128xf32>
    %80 = vector.broadcast %59 : f32 to vector<8x128xf32>
    %81 = arith.mulf %80, %74 : vector<8x128xf32>
    %82 = arith.addf %79, %81 : vector<8x128xf32>
    %83 = vector.broadcast %66 : f32 to vector<8x128xf32>
    %84 = arith.addf %82, %83 : vector<8x128xf32>
    %c1_36 = arith.constant 1 : index
    %c0_37 = arith.constant 0 : index
    %c0_38 = arith.constant 0 : index
    %c0_39 = arith.constant 0 : index
    %85 = vector.load %arg3[%c1_36, %c0_37, %c0_38, %c0_39] : memref<2x3x8x128xf32, #tpu.memory_space<vmem>>, vector<1x1x8x128xf32>
    %86 = vector.shape_cast %85 : vector<1x1x8x128xf32> to vector<8x128xf32>
    %87 = vector.shape_cast %84 : vector<8x128xf32> to vector<1x1x8x128xf32>
    tpu.vector_store %arg3[%c1_36, %c0_37, %c0_38, %c0_39], %87 {strides = array<i32>} : memref<2x3x8x128xf32, #tpu.memory_space<vmem>>, vector<1x1x8x128xf32>,
    %88 = vector.broadcast %60 : f32 to vector<8x128xf32>
    %89 = arith.mulf %88, %70 : vector<8x128xf32>
    %90 = vector.broadcast %61 : f32 to vector<8x128xf32>
    %91 = arith.mulf %90, %72 : vector<8x128xf32>
    %92 = arith.addf %89, %91 : vector<8x128xf32>
    %93 = vector.broadcast %62 : f32 to vector<8x128xf32>
    %94 = arith.mulf %93, %74 : vector<8x128xf32>
    %95 = arith.addf %92, %94 : vector<8x128xf32>
    %96 = vector.broadcast %67 : f32 to vector<8x128xf32>
    %97 = arith.addf %95, %96 : vector<8x128xf32>
    %c1_40 = arith.constant 1 : index
    %c1_41 = arith.constant 1 : index
    %c0_42 = arith.constant 0 : index
    %c0_43 = arith.constant 0 : index
    %98 = vector.load %arg3[%c1_40, %c1_41, %c0_42, %c0_43] : memref<2x3x8x128xf32, #tpu.memory_space<vmem>>, vector<1x1x8x128xf32>
    %99 = vector.shape_cast %98 : vector<1x1x8x128xf32> to vector<8x128xf32>
    %100 = vector.shape_cast %97 : vector<8x128xf32> to vector<1x1x8x128xf32>
    tpu.vector_store %arg3[%c1_40, %c1_41, %c0_42, %c0_43], %100 {strides = array<i32>} : memref<2x3x8x128xf32, #tpu.memory_space<vmem>>, vector<1x1x8x128xf32>,
    %101 = vector.broadcast %63 : f32 to vector<8x128xf32>
    %102 = arith.mulf %101, %70 : vector<8x128xf32>
    %103 = vector.broadcast %64 : f32 to vector<8x128xf32>
    %104 = arith.mulf %103, %72 : vector<8x128xf32>
    %105 = arith.addf %102, %104 : vector<8x128xf32>
    %106 = vector.broadcast %65 : f32 to vector<8x128xf32>
    %107 = arith.mulf %106, %74 : vector<8x128xf32>
    %108 = arith.addf %105, %107 : vector<8x128xf32>
    %109 = vector.broadcast %68 : f32 to vector<8x128xf32>
    %110 = arith.addf %108, %109 : vector<8x128xf32>
    %c1_44 = arith.constant 1 : index
    %c2_45 = arith.constant 2 : index
    %c0_46 = arith.constant 0 : index
    %c0_47 = arith.constant 0 : index
    %111 = vector.load %arg3[%c1_44, %c2_45, %c0_46, %c0_47] : memref<2x3x8x128xf32, #tpu.memory_space<vmem>>, vector<1x1x8x128xf32>
    %112 = vector.shape_cast %111 : vector<1x1x8x128xf32> to vector<8x128xf32>
    %113 = vector.shape_cast %110 : vector<8x128xf32> to vector<1x1x8x128xf32>
    tpu.vector_store %arg3[%c1_44, %c2_45, %c0_46, %c0_47], %113 {strides = array<i32>} : memref<2x3x8x128xf32, #tpu.memory_space<vmem>>, vector<1x1x8x128xf32>,
    return
  }
  func.func @transform_0(%arg0: i32) -> i32 {
    %c0_i32 = arith.constant 0 : i32
    %c0_i32_0 = arith.constant 0 : i32
    return %c0_i32 : i32
  }
  func.func @transform_1(%arg0: i32) -> (i32, i32, i32, i32) {
    %c0_i32 = arith.constant 0 : i32
    %c0_i32_0 = arith.constant 0 : i32
    %c0_i32_1 = arith.constant 0 : i32
    %c0_i32_2 = arith.constant 0 : i32
    %c0_i32_3 = arith.constant 0 : i32
    return %c0_i32, %c0_i32_0, %c0_i32_1, %c0_i32_2 : i32, i32, i32, i32
  }
  func.func @transform_2(%arg0: i32) -> (i32, i32, i32, i32) {
    %c0_i32 = arith.constant 0 : i32
    %c0_i32_0 = arith.constant 0 : i32
    %c0_i32_1 = arith.constant 0 : i32
    %c0_i32_2 = arith.constant 0 : i32
    %c0_i32_3 = arith.constant 0 : i32
    return %c0_i32, %c0_i32_0, %c0_i32_1, %c0_i32_2 : i32, i32, i32, i32
  }
}

module attributes {stable_mosaic.version = 11 : i64} {
  func.func @_depth_mask_kernel(%arg0: i32, %arg1: memref<3xi32, #tpu.memory_space<smem>>, %arg2: memref<8x32x256xf32, #tpu.memory_space<vmem>>, %arg3: memref<32x256xi32, #tpu.memory_space<vmem>>, %arg4: memref<32x256xf32, #tpu.memory_space<vmem>>, %arg5: memref<2x32x256xi8, #tpu.memory_space<vmem>>) attributes {dimension_semantics = [#tpu.dimension_semantics<parallel>], iteration_bounds = array<i64: 2>, scalar_prefetch = 0 : i64, scratch_operands = 0 : i64, tpu.core_type = #tpu.core_type<tc>, window_params = [{transform_indices = @transform_0, window_bounds = array<i64: 3>}, {transform_indices = @transform_1, window_bounds = array<i64: 8, 32, 256>}, {transform_indices = @transform_2, window_bounds = array<i64: 32, 256>}, {transform_indices = @transform_3, window_bounds = array<i64: 32, 256>}, {transform_indices = @transform_4, window_bounds = array<i64: 2, 32, 256>}]} {
    %c0 = arith.constant 0 : index
    %c0_0 = arith.constant 0 : index
    %c0_1 = arith.constant 0 : index
    %0 = vector.load %arg2[%c0, %c0_0, %c0_1] : memref<8x32x256xf32, #tpu.memory_space<vmem>>, vector<1x32x256xf32>
    %1 = vector.shape_cast %0 : vector<1x32x256xf32> to vector<32x256xf32>
    %cst = arith.constant 0.000000e+00 : f32
    %2 = vector.broadcast %cst : f32 to vector<32x256xf32>
    %3 = arith.cmpf oge, %1, %2 : vector<32x256xf32>
    %cst_2 = arith.constant 4.000000e+00 : f32
    %4 = vector.broadcast %cst_2 : f32 to vector<32x256xf32>
    %5 = arith.select %3, %1, %4 : vector<32x256xi1>, vector<32x256xf32>
    %c1 = arith.constant 1 : index
    %c0_3 = arith.constant 0 : index
    %c0_4 = arith.constant 0 : index
    %6 = vector.load %arg2[%c1, %c0_3, %c0_4] : memref<8x32x256xf32, #tpu.memory_space<vmem>>, vector<1x32x256xf32>
    %7 = vector.shape_cast %6 : vector<1x32x256xf32> to vector<32x256xf32>
    %cst_5 = arith.constant 0.000000e+00 : f32
    %8 = vector.broadcast %cst_5 : f32 to vector<32x256xf32>
    %9 = arith.cmpf oge, %7, %8 : vector<32x256xf32>
    %cst_6 = arith.constant 4.000000e+00 : f32
    %10 = vector.broadcast %cst_6 : f32 to vector<32x256xf32>
    %11 = arith.select %9, %7, %10 : vector<32x256xi1>, vector<32x256xf32>
    %12 = arith.minimumf %5, %11 : vector<32x256xf32>
    %c2 = arith.constant 2 : index
    %c0_7 = arith.constant 0 : index
    %c0_8 = arith.constant 0 : index
    %13 = vector.load %arg2[%c2, %c0_7, %c0_8] : memref<8x32x256xf32, #tpu.memory_space<vmem>>, vector<1x32x256xf32>
    %14 = vector.shape_cast %13 : vector<1x32x256xf32> to vector<32x256xf32>
    %cst_9 = arith.constant 0.000000e+00 : f32
    %15 = vector.broadcast %cst_9 : f32 to vector<32x256xf32>
    %16 = arith.cmpf oge, %14, %15 : vector<32x256xf32>
    %cst_10 = arith.constant 4.000000e+00 : f32
    %17 = vector.broadcast %cst_10 : f32 to vector<32x256xf32>
    %18 = arith.select %16, %14, %17 : vector<32x256xi1>, vector<32x256xf32>
    %19 = arith.minimumf %12, %18 : vector<32x256xf32>
    %c3 = arith.constant 3 : index
    %c0_11 = arith.constant 0 : index
    %c0_12 = arith.constant 0 : index
    %20 = vector.load %arg2[%c3, %c0_11, %c0_12] : memref<8x32x256xf32, #tpu.memory_space<vmem>>, vector<1x32x256xf32>
    %21 = vector.shape_cast %20 : vector<1x32x256xf32> to vector<32x256xf32>
    %cst_13 = arith.constant 0.000000e+00 : f32
    %22 = vector.broadcast %cst_13 : f32 to vector<32x256xf32>
    %23 = arith.cmpf oge, %21, %22 : vector<32x256xf32>
    %cst_14 = arith.constant 4.000000e+00 : f32
    %24 = vector.broadcast %cst_14 : f32 to vector<32x256xf32>
    %25 = arith.select %23, %21, %24 : vector<32x256xi1>, vector<32x256xf32>
    %26 = arith.minimumf %19, %25 : vector<32x256xf32>
    %c4 = arith.constant 4 : index
    %c0_15 = arith.constant 0 : index
    %c0_16 = arith.constant 0 : index
    %27 = vector.load %arg2[%c4, %c0_15, %c0_16] : memref<8x32x256xf32, #tpu.memory_space<vmem>>, vector<1x32x256xf32>
    %28 = vector.shape_cast %27 : vector<1x32x256xf32> to vector<32x256xf32>
    %cst_17 = arith.constant 0.000000e+00 : f32
    %29 = vector.broadcast %cst_17 : f32 to vector<32x256xf32>
    %30 = arith.cmpf oge, %28, %29 : vector<32x256xf32>
    %cst_18 = arith.constant 4.000000e+00 : f32
    %31 = vector.broadcast %cst_18 : f32 to vector<32x256xf32>
    %32 = arith.select %30, %28, %31 : vector<32x256xi1>, vector<32x256xf32>
    %33 = arith.minimumf %26, %32 : vector<32x256xf32>
    %c5 = arith.constant 5 : index
    %c0_19 = arith.constant 0 : index
    %c0_20 = arith.constant 0 : index
    %34 = vector.load %arg2[%c5, %c0_19, %c0_20] : memref<8x32x256xf32, #tpu.memory_space<vmem>>, vector<1x32x256xf32>
    %35 = vector.shape_cast %34 : vector<1x32x256xf32> to vector<32x256xf32>
    %cst_21 = arith.constant 0.000000e+00 : f32
    %36 = vector.broadcast %cst_21 : f32 to vector<32x256xf32>
    %37 = arith.cmpf oge, %35, %36 : vector<32x256xf32>
    %cst_22 = arith.constant 4.000000e+00 : f32
    %38 = vector.broadcast %cst_22 : f32 to vector<32x256xf32>
    %39 = arith.select %37, %35, %38 : vector<32x256xi1>, vector<32x256xf32>
    %40 = arith.minimumf %33, %39 : vector<32x256xf32>
    %c6 = arith.constant 6 : index
    %c0_23 = arith.constant 0 : index
    %c0_24 = arith.constant 0 : index
    %41 = vector.load %arg2[%c6, %c0_23, %c0_24] : memref<8x32x256xf32, #tpu.memory_space<vmem>>, vector<1x32x256xf32>
    %42 = vector.shape_cast %41 : vector<1x32x256xf32> to vector<32x256xf32>
    %cst_25 = arith.constant 0.000000e+00 : f32
    %43 = vector.broadcast %cst_25 : f32 to vector<32x256xf32>
    %44 = arith.cmpf oge, %42, %43 : vector<32x256xf32>
    %cst_26 = arith.constant 4.000000e+00 : f32
    %45 = vector.broadcast %cst_26 : f32 to vector<32x256xf32>
    %46 = arith.select %44, %42, %45 : vector<32x256xi1>, vector<32x256xf32>
    %47 = arith.minimumf %40, %46 : vector<32x256xf32>
    %c7 = arith.constant 7 : index
    %c0_27 = arith.constant 0 : index
    %c0_28 = arith.constant 0 : index
    %48 = vector.load %arg2[%c7, %c0_27, %c0_28] : memref<8x32x256xf32, #tpu.memory_space<vmem>>, vector<1x32x256xf32>
    %49 = vector.shape_cast %48 : vector<1x32x256xf32> to vector<32x256xf32>
    %cst_29 = arith.constant 0.000000e+00 : f32
    %50 = vector.broadcast %cst_29 : f32 to vector<32x256xf32>
    %51 = arith.cmpf oge, %49, %50 : vector<32x256xf32>
    %cst_30 = arith.constant 4.000000e+00 : f32
    %52 = vector.broadcast %cst_30 : f32 to vector<32x256xf32>
    %53 = arith.select %51, %49, %52 : vector<32x256xi1>, vector<32x256xf32>
    %54 = arith.minimumf %47, %53 : vector<32x256xf32>
    %cst_31 = arith.constant 4.000000e+00 : f32
    %55 = vector.broadcast %cst_31 : f32 to vector<32x256xf32>
    %56 = arith.cmpf one, %54, %55 : vector<32x256xf32>
    %cst_32 = arith.constant 0.000000e+00 : f32
    %57 = vector.broadcast %cst_32 : f32 to vector<32x256xf32>
    %58 = arith.select %56, %54, %57 : vector<32x256xi1>, vector<32x256xf32>
    %c0_33 = arith.constant 0 : index
    %c0_34 = arith.constant 0 : index
    %59 = vector.load %arg4[%c0_33, %c0_34] : memref<32x256xf32, #tpu.memory_space<vmem>>, vector<32x256xf32>
    tpu.vector_store %arg4[%c0_33, %c0_34], %58 {strides = array<i32>} : memref<32x256xf32, #tpu.memory_space<vmem>>, vector<32x256xf32>,
    %c0_35 = arith.constant 0 : index
    %c0_36 = arith.constant 0 : index
    %60 = vector.load %arg3[%c0_35, %c0_36] : memref<32x256xi32, #tpu.memory_space<vmem>>, vector<32x256xi32>
    %c0_37 = arith.constant 0 : index
    %61 = memref.load %arg1[%c0_37] : memref<3xi32, #tpu.memory_space<smem>>
    %62 = vector.broadcast %61 : i32 to vector<32x256xi32>
    %63 = arith.cmpi sge, %60, %62 : vector<32x256xi32>
    %c1_38 = arith.constant 1 : index
    %64 = memref.load %arg1[%c1_38] : memref<3xi32, #tpu.memory_space<smem>>
    %65 = vector.broadcast %64 : i32 to vector<32x256xi32>
    %66 = arith.cmpi sge, %60, %65 : vector<32x256xi32>
    %cst_39 = arith.constant dense<true> : vector<32x256xi1>
    %67 = arith.xori %66, %cst_39 : vector<32x256xi1>
    %68 = arith.andi %63, %67 : vector<32x256xi1>
    %69 = arith.extui %68 : vector<32x256xi1> to vector<32x256xi8>
    %c0_40 = arith.constant 0 : index
    %c0_41 = arith.constant 0 : index
    %c0_42 = arith.constant 0 : index
    %70 = vector.load %arg5[%c0_40, %c0_41, %c0_42] : memref<2x32x256xi8, #tpu.memory_space<vmem>>, vector<1x32x256xi8>
    %71 = vector.shape_cast %70 : vector<1x32x256xi8> to vector<32x256xi8>
    %72 = vector.shape_cast %69 : vector<32x256xi8> to vector<1x32x256xi8>
    tpu.vector_store %arg5[%c0_40, %c0_41, %c0_42], %72 {strides = array<i32>} : memref<2x32x256xi8, #tpu.memory_space<vmem>>, vector<1x32x256xi8>,
    %c2_43 = arith.constant 2 : index
    %73 = memref.load %arg1[%c2_43] : memref<3xi32, #tpu.memory_space<smem>>
    %74 = vector.broadcast %73 : i32 to vector<32x256xi32>
    %75 = arith.cmpi sge, %60, %74 : vector<32x256xi32>
    %cst_44 = arith.constant dense<true> : vector<32x256xi1>
    %76 = arith.xori %75, %cst_44 : vector<32x256xi1>
    %77 = arith.andi %66, %76 : vector<32x256xi1>
    %78 = arith.extui %77 : vector<32x256xi1> to vector<32x256xi8>
    %c1_45 = arith.constant 1 : index
    %c0_46 = arith.constant 0 : index
    %c0_47 = arith.constant 0 : index
    %79 = vector.load %arg5[%c1_45, %c0_46, %c0_47] : memref<2x32x256xi8, #tpu.memory_space<vmem>>, vector<1x32x256xi8>
    %80 = vector.shape_cast %79 : vector<1x32x256xi8> to vector<32x256xi8>
    %81 = vector.shape_cast %78 : vector<32x256xi8> to vector<1x32x256xi8>
    tpu.vector_store %arg5[%c1_45, %c0_46, %c0_47], %81 {strides = array<i32>} : memref<2x32x256xi8, #tpu.memory_space<vmem>>, vector<1x32x256xi8>,
    return
  }
  func.func @transform_0(%arg0: i32) -> i32 {
    %c0_i32 = arith.constant 0 : i32
    %c0_i32_0 = arith.constant 0 : i32
    return %c0_i32 : i32
  }
  func.func @transform_1(%arg0: i32) -> (i32, i32, i32) {
    %c0_i32 = arith.constant 0 : i32
    %c0_i32_0 = arith.constant 0 : i32
    %c0_i32_1 = arith.constant 0 : i32
    return %c0_i32, %arg0, %c0_i32_0 : i32, i32, i32
  }
  func.func @transform_2(%arg0: i32) -> (i32, i32) {
    %c0_i32 = arith.constant 0 : i32
    %c0_i32_0 = arith.constant 0 : i32
    return %arg0, %c0_i32 : i32, i32
  }
  func.func @transform_3(%arg0: i32) -> (i32, i32) {
    %c0_i32 = arith.constant 0 : i32
    %c0_i32_0 = arith.constant 0 : i32
    return %arg0, %c0_i32 : i32, i32
  }
  func.func @transform_4(%arg0: i32) -> (i32, i32, i32) {
    %c0_i32 = arith.constant 0 : i32
    %c0_i32_0 = arith.constant 0 : i32
    %c0_i32_1 = arith.constant 0 : i32
    return %c0_i32, %arg0, %c0_i32_0 : i32, i32, i32
  }
}

</mosaic_0001>

<bundles_post_ra>
// kernel: _forward_impl.2
= control target key start
LH: loop header
LB: loop body
LE: loop exit
PB: predicated region body
PF: predicated region fallthrough
CT: control target
= control target key end

     0   :  { %7 = vsyncpa [#allocation3], 0  ;;  %s292_s0 = inlined_call_operand.vmem [shape: f32[24], index: 0, kind: input, shape index: {}]   ;;  %s293_s1 = inlined_call_operand.vmem [shape: f32[2,3,8,128], index: 1, kind: input, shape index: {}]   ;;  %s294_s2 = inlined_call_operand.vmem [shape: f32[2,3,8,128], index: 2, kind: output, shape index: {}]  }
   0x1   :  { %s14_s11 = sshll.u32 %s292_s0, 4  ;;  %s15_s11 = int_to_ptr.vmem [resolvable:$true] %s14_s11 }
   0x2   :  { %s169_s12 = scalar_lea.vmem %s15_s11, 16  ;;  %p174_p1 = scmp.lt.s32.totalorder %s15_s11, %s15_s11 }
   0x3   :  { %p170_p0 = scmp.ne.s32.totalorder %s15_s11, %s169_s12  ;;  %p175_p2 = scmp.lt.s32.totalorder %s169_s12, %s169_s12 }
   0x5   :  { %p176_p3 = por %p175_p2, %p174_p1 }
   0x7   :  { %p177_p4 = pnand %p176_p3, %p170_p0 }
   0x9   :  { %180 = shalt.err (!%p177_p4)
}
   0xa   :  { %s183_s13 = smov [#allocation2]  }
   0xb   :  { %17 = dma.vmem_to_smem %s15_s11, 16, %s183_s13, [#allocation3]  }
   0xc   :  { %181 = dma.done.wait [#allocation3], 16  }
   0xd   :  { %182 = vsyncadd [#allocation3], 4294967280 }
   0xe   :  { %23 = sfence }
   0xf   :  { %s24_s14 = sld [smem:[#allocation2]]  ;;  %s135_s15 = sld [smem:[#allocation2 + $0x1]]  ;;  %v36_v0 = vld [vmem:[%s293_s1] sm:$0xff]  ;;  %v146_v1 = vld [vmem:[%s293_s1 + $0x8] sm:$0xff]  ;;  %v147_v2 = vld [vmem:[%s293_s1 + $0x10] sm:$0xff] }
  0x10   :  { %s136_s16 = sld [smem:[#allocation2 + $0x2]]  ;;  %s202_s17 = sld [smem:[#allocation2 + $0x9]]  ;;  %v162_v23 = vld [vmem:[%s293_s1 + $0x18] sm:$0xff]  ;;  %v163_v24 = vld [vmem:[%s293_s1 + $0x20] sm:$0xff]  ;;  %v164_v25 = vld [vmem:[%s293_s1 + $0x28] sm:$0xff] }
  0x11   :  { %s137_s18 = sld [smem:[#allocation2 + $0x3]]  ;;  %s138_s0 = sld [smem:[#allocation2 + $0x4]] }
  0x12   :  { %s139_s19 = sld [smem:[#allocation2 + $0x5]]  ;;  %s204_s20 = sld [smem:[#allocation2 + $0xa]] }
  0x13   :  { %s212_s25 = sld [smem:[#allocation2 + $0x6]]  ;;  %s214_s26 = sld [smem:[#allocation2 + $0x7]] }
  0x14   :  { %s219_s29 = sld [smem:[#allocation2 + $0x8]]  ;;  %s221_s30 = sld [smem:[#allocation2 + $0xb]] }
  0x15   :  { %v41_v3 = vstv %s24_s14  ;;  %v43_v4 = vstv %s135_s15  ;;  %s223_s3 = sld [smem:[#allocation2 + $0xc]]  ;;  %s225_s4 = sld [smem:[#allocation2 + $0xd]] }
  0x16   :  { %v42_v5 = vmul.f32 %v41_v3, %v36_v0  ;;  %v44_v6 = vmul.f32 %v146_v1, %v43_v4  ;;  %v46_v7 = vstv %s136_s16  ;;  %s227_s5 = sld [smem:[#allocation2 + $0xe]]  ;;  %s229_s6 = sld [smem:[#allocation2 + $0xf]]  ;;  %v49_v15 = vstv %s202_s17 }
  0x17   :  { %v47_v8 = vmul.f32 %v147_v2, %v46_v7  ;;  %v52_v9 = vstv %s137_s18  ;;  %v54_v10 = vstv %s138_s0  ;;  %s231_s7 = sld [smem:[#allocation2 + $0x10]]  ;;  %s233_s8 = sld [smem:[#allocation2 + $0x15]] }
  0x18   :  { %v45_v11 = vadd.f32 %v44_v6, %v42_v5  ;;  %v53_v12 = vmul.f32 %v52_v9, %v36_v0  ;;  %v55_v13 = vmul.f32 %v146_v1, %v54_v10  ;;  %v57_v14 = vstv %s139_s19  ;;  %s235_s9 = sld [smem:[#allocation2 + $0x11]]  ;;  %s240_s10 = sld [smem:[#allocation2 + $0x12]] }
  0x19   :  { %v58_v16 = vmul.f32 %v147_v2, %v57_v14  ;;  %v64_v17 = vstv %s212_s25  ;;  %v66_v18 = vstv %s214_s26  ;;  %s242_s11 = sld [smem:[#allocation2 + $0x13]]  ;;  %s253_s18 = sld [smem:[#allocation2 + $0x14]]  ;;  %v60_v26 = vstv %s204_s20 }
  0x1a   :  { %v48_v19 = vadd.f32 %v47_v8, %v45_v11  ;;  %v56_v20 = vadd.f32 %v55_v13, %v53_v12  ;;  %v65_v21 = vmul.f32 %v64_v17, %v36_v0  ;;  %v67_v22 = vmul.f32 %v146_v1, %v66_v18  ;;  %s259_s0 = sld [smem:[#allocation2 + $0x16]]  ;;  %s263_s1 = sld [smem:[#allocation2 + $0x17]] }
  0x1b   :  { %v69_v27 = vstv %s219_s29  ;;  %v94_v28 = vstv %s223_s3  ;;  %v96_v29 = vstv %s225_s4  ;;  %v72_v34 = vstv %s221_s30 }
  0x1c   :  { %v50_v30 = vadd.f32 %v49_v15, %v48_v19  ;;  %v59_v31 = vadd.f32 %v58_v16, %v56_v20  ;;  %v68_v32 = vadd.f32 %v67_v22, %v65_v21  ;;  %v70_v33 = vmul.f32 %v147_v2, %v69_v27 }
  0x1d   :  { %v95_v35 = vmul.f32 %v162_v23, %v94_v28  ;;  %v97_v36 = vmul.f32 %v163_v24, %v96_v29  ;;  %v99_v37 = vstv %s227_s5  ;;  %v106_v41 = vstv %s229_s6 }
  0x1e   :  { %51 = vst [vmem:[%s294_s2] sm:$0xff] %v50_v30  ;;  %v61_v38 = vadd.f32 %v60_v26, %v59_v31  ;;  %v71_v39 = vadd.f32 %v70_v33, %v68_v32  ;;  %v100_v40 = vmul.f32 %v164_v25, %v99_v37  ;;  %v107_v43 = vmul.f32 %v162_v23, %v106_v41 }
  0x1f   :  { %v98_v42 = vadd.f32 %v97_v36, %v95_v35  ;;  %v108_v44 = vstv %s231_s7  ;;  %v111_v45 = vstv %s235_s9  ;;  %v102_v47 = vstv %s233_s8 }
  0x20   :  { %148 = vst [vmem:[%s294_s2 + $0x8] sm:$0xff] %v61_v38  ;;  %v73_v46 = vadd.f32 %v72_v34, %v71_v39  ;;  %v109_v48 = vmul.f32 %v163_v24, %v108_v44  ;;  %v112_v49 = vmul.f32 %v164_v25, %v111_v45  ;;  %v118_v51 = vstv %s240_s10 }
  0x21   :  { %v101_v50 = vadd.f32 %v100_v40, %v98_v42  ;;  %v120_v52 = vstv %s242_s11  ;;  %v123_v53 = vstv %s253_s18  ;;  %v119_v55 = vmul.f32 %v162_v23, %v118_v51 }
  0x22   :  { %149 = vst [vmem:[%s294_s2 + $0x10] sm:$0xff] %v73_v46  ;;  %v110_v54 = vadd.f32 %v109_v48, %v107_v43  ;;  %v121_v56 = vmul.f32 %v163_v24, %v120_v52  ;;  %v124_v57 = vmul.f32 %v164_v25, %v123_v53  ;;  %v114_v59 = vstv %s259_s0 }
  0x23   :  { %v103_v58 = vadd.f32 %v102_v47, %v101_v50  ;;  %v126_v62 = vstv %s263_s1 }
  0x24   :  { %v113_v60 = vadd.f32 %v112_v49, %v110_v54  ;;  %v122_v61 = vadd.f32 %v121_v56, %v119_v55 }
  0x25   :  { %165 = vst [vmem:[%s294_s2 + $0x18] sm:$0xff] %v103_v58 }
  0x26   :  { %v115_v63 = vadd.f32 %v114_v59, %v113_v60  ;;  %v125_v0 = vadd.f32 %v124_v57, %v122_v61 }
  0x28   :  { %166 = vst [vmem:[%s294_s2 + $0x20] sm:$0xff] %v115_v63  ;;  %v127_v1 = vadd.f32 %v126_v62, %v125_v0 }
  0x2a   :  { %167 = vst [vmem:[%s294_s2 + $0x28] sm:$0xff] %v127_v1 }
  0x2b   :  { %134 = vsyncpa [#allocation3], 1 }

// kernel: _forward_impl.3
= control target key start
LH: loop header
LB: loop body
LE: loop exit
PB: predicated region body
PF: predicated region fallthrough
CT: control target
= control target key end

     0   :  { %10 = vsyncpa [#allocation5], 0  ;;  %s1657_s0 = inlined_call_operand.vmem [shape: s32[3], index: 0, kind: input, shape index: {}]   ;;  %s1658_s1 = inlined_call_operand.hbm [shape: f32[8,64,256], index: 1, kind: input, shape index: {}]   ;;  %s1659_s2 = inlined_call_operand.vmem [shape: s32[64,256], index: 2, kind: input, shape index: {}]   ;;  %s1660_s3 = inlined_call_operand.hbm [shape: f32[64,256], index: 3, kind: output, shape index: {0}]   ;;  %s1661_s4 = inlined_call_operand.hbm [shape: s8[2,64,256], index: 4, kind: output, shape index: {1}]  }
   0x1   :  { %11 = vsyncpa [#allocation3], 0 }
   0x2   :  { %13 = vsyncpa [#allocation3 + $0x1], 0 }
   0x3   :  { %14 = vsyncpa [#allocation4], 0 }
   0x4   :  { %16 = vsyncpa [#allocation4 + $0x1], 0 }
   0x5   :  { %17 = vsyncpa [#allocation9], 0 }
   0x6   :  { %19 = vsyncpa [#allocation9 + $0x1], 0  ;;  %s1157_s15 = smov 0   ;;  %s1159_s16 = smov 0  }
   0x7   :  { %s1161_s17 = smov 0   ;;  %s1163_s18 = smov 0  }
   0x8 LB: > { %s1178_s19 = sadd.s32 4294967295, %s1116_s18   ;;  %s831_s20 = sadd.s32 4294967294, %s1116_s18   ;;  %s1116_s18 = sphi %s1163_s18, %s1707_s18   ;;  %s1112_s17 = sphi %s1161_s17, %s1706_s17   ;;  %s1108_s16 = sphi %s1159_s16, %s1705_s16   ;;  %s1104_s15 = sphi %s1157_s15, %s1704_s15  }
   0x9   : > { %s1182_s21 = sadd.s32 1, %s1116_s18   ;;  %s53_s22 = sadd.s32 1, %s1112_s17 }
   0xa   : > { %s50_s23 = ssub.s32 %s1116_s18, %s1182_s21  ;;  %p60_p0 = scmp.ne.s32.totalorder %s1112_s17, %s1108_s16 }
   0xb   : > { %p51_p1 = scmp.eq.s32.totalorder %s50_s23, 0  ;;  %p61_p2 = scmp.eq.s32.totalorder %s1116_s18, 0 }
   0xc   : > { %p66_p3 = scmp.ne.s32.totalorder %s1108_s16, %s1104_s15  ;;  %p67_p4 = scmp.eq.s32.totalorder %s1178_s19, 0 }
   0xd   : > { %s1194_s24 = scalar_select %p51_p1, %s1112_s17, %s53_s22  }
   0xe   : > { %p1196_p5 = por %p61_p2, %p60_p0  ;;  %p1202_p6 = por %p67_p4, %p66_p3 }
   0xf   : > { %p116_p7 = scmp.eq.s32.totalorder %s1178_s19, 1  ;;  %p122_p8 = scmp.eq.s32.totalorder %s831_s20, 1 }
  0x10   : > { %s1676_s26 = scalar_select %p1202_p6, 1, 0 }
  0x11   : > { %p832_p9 = scmp.ge.s32.totalorder %s1116_s18, 1  ;;  %p155_p10 = scmp.lt.s32.totalorder %s1116_s18, 3 }
  0x12   : > { %p1209_p11 = por %p116_p7, %p60_p0  ;;  %p1213_p12 = por %p122_p8, %p66_p3 }
  0x13   : > { %p1217_p13 = pnand %p832_p9, %p155_p10  ;;  %s168_s6 = sshll.u32 %s1657_s0, 4  ;;  %s169_s6 = int_to_ptr.vmem [resolvable:$true] %s168_s6 }
  0x14   : > { %s1677_s27 = scalar_select %p1209_p11, 1, 0 }
  0x15   : > { %s1678_s28 = scalar_select %p1213_p12, 1, 0 }
  0x16   : > { %p941_p1 = pneg %p1217_p13  ;;  %s999_s7 = scalar_lea.vmem %s169_s6, 16 }
  0x17   : > { %p1000_p2 = scmp.ne.s32.totalorder %s169_s6, %s999_s7  ;;  %p1007_p12 = scmp.lt.s32.totalorder %s169_s6, %s169_s6 }
  0x18   : > { %p942_p0 = pnand %p941_p1, %p67_p4  ;;  %p1008_p9 = scmp.lt.s32.totalorder %s999_s7, %s999_s7 }
  0x1a   : > { %p1001_p3 = pneg %p942_p0  ;;  %p1009_p10 = por %p1008_p9, %p1007_p12 }
  0x1c   : > { %p1002_p7 = pnand %p1001_p3, %p1000_p2 }
  0x1e   : > { %p1003_p8 = pneg %p1002_p7 }
  0x20   : > { %p1010_p11 = pnand %p1009_p10, %p1003_p8 }
  0x22   : > { %1013 = shalt.err (!%p1010_p11)
}
  0x23   : > { %s1118_s8 = smov [#allocation2]   ;;  %p834_p6 = scmp.ge.s32.totalorder %s1116_s18, 2 }
  0x24   : > { %944 = dma.vmem_to_smem (!%p942_p0), %s169_s6, 16, %s1118_s8, [#allocation5]  }
  0x25   : > { %175 = sbr.rel (%p834_p6) target bundleno = 57 (0x39), region = 20 }
  0x2c   : > { %s179_s9 = sand.u32 1, %s1112_s17   ;;  %s919_s10 = sshll.u32 %s1116_s18, 10 }
  0x2d   : > { %s835_s11 = sshll.u32 %s179_s9, 9  ;;  %s190_s14 = scalar_lea.hbm %s1658_s1, %s919_s10 }
  0x2e   : > { %s926_s20 = scalar_select %p1196_p5, [#allocation0], [#allocation12] }
  0x2f   : > { %s183_s22 = scalar_lea.vmem [#allocation6], %s835_s11  ;;  %s1119_s5 = smov 2048  }
  0x30   : > { %s203_s23 = sshll.u32 %s183_s22, 4  ;;  %s195_s30 = sld [smem:[%s926_s20]]   ;;  %s204_s23 = int_to_ptr.vmem [resolvable:$true] %s203_s23 }
  0x31   : > { %927 = sst [smem:[#allocation11]] (%p1196_p5), %s1119_s5  ;;  %s1120_s6 = smov 1024  }
  0x32   : > { %928 = sst [smem:[#allocation11 + $0x1]] (%p1196_p5), %s1120_s6  ;;  %s1121_s7 = smov 4  }
  0x33   : > { %929 = sst [smem:[#allocation11 + $0x2]] (%p1196_p5), %s1121_s7  ;;  %s1122_s8 = smov 256  }
  0x34   : > { %930 = sst [smem:[#allocation11 + $0x3]] (%p1196_p5), %s1122_s8  ;;  %s1123_s11 = smov 16  }
  0x35   : > { %931 = sst [smem:[#allocation11 + $0x4]] (%p1196_p5), %s1122_s8  ;;  %s180_s13 = scalar_lea.sflag [#allocation3], %s179_s9 }
  0x36   : > { %s839_s10 = sshll.u32 %s195_s30, 26  ;;  %932 = sst [smem:[#allocation11 + $0x5]] (%p1196_p5), %s1123_s11 }
  0x37   : > { %s840_s12 = sadd.s32 134217728, %s839_s10  ;;  %s1124_s20 = smov [#allocation10]  }
  0x38   : > { %933 = dma.general (%p1196_p5), %s190_s14, 8192, %s204_s23, %s180_s13, %s1124_s20, [#allocation11], %s840_s12, 0  }
  0x39 PF: > { %238 = sbr.rel (%p1217_p13) target bundleno = 194 (0xc2), region = 32 }
  0x40   : > { %1087 = dma.done.wait (%p67_p4), [#allocation5], 16  }
  0x41   : > { %1089 = vsyncadd (%p67_p4), [#allocation5], 4294967280  ;;  %s1259_s22 = sand.u32 1, %s1108_s16   ;;  %p1680_p5 = scmp.ne.s32.totalorder %s1676_s26, 0 }
  0x42   : > { %s843_s9 = sshll.u32 %s1259_s22, 9  ;;  %s245_s30 = scalar_lea.sflag [#allocation3], %s1259_s22 }
  0x43   : > { %s1263_s25 = scalar_lea.vmem [#allocation6], %s843_s9 }
  0x44   : > { %1091 = dma.done.wait (%p1680_p5), %s245_s30, 8192  }
  0x45   : > { %1093 = vsyncadd (%p1680_p5), %s245_s30, 4294959104 }
  0x46   : > { %253 = sfence }
  0x47   : > { %v296_v0 = vld [vmem:[%s1263_s25] sm:$0xff]  ;;  %v297_v12 = vld [vmem:[%s1263_s25 + $0x8] sm:$0xff]  ;;  %v298_v29 = vld [vmem:[%s1263_s25 + $0x10] sm:$0xff]  ;;  %s844_s26 = sshll.u32 %s1259_s22, 6  ;;  %s846_s14 = sshll.u32 %s1178_s19, 2 }
  0x48   : > { %v849_v1 = vld [vmem:[%s1263_s25 + $0x40] sm:$0xff]  ;;  %vm304_vm0 = vcmp.ge.f32.partialorder %v296_v0, 0.0  ;;  %v850_v15 = vld [vmem:[%s1263_s25 + $0x48] sm:$0xff]  ;;  %vm305_vm8 = vcmp.ge.f32.partialorder %v297_v12, 0.0  ;;  %v851_v30 = vld [vmem:[%s1263_s25 + $0x50] sm:$0xff]  ;;  %vm306_vm15 = vcmp.ge.f32.partialorder %v298_v29, 0.0 }
  0x49   : > { %v857_v2 = vld [vmem:[%s1263_s25 + $0x80] sm:$0xff]  ;;  %vm329_vm1 = vcmp.ge.f32.partialorder %v849_v1, 0.0  ;;  %v312_v5 = vsel %vm304_vm0, %v296_v0, 4.0  ;;  %v858_v16 = vld [vmem:[%s1263_s25 + $0x88] sm:$0xff]  ;;  %v313_v23 = vsel %vm305_vm8, %v297_v12, 4.0  ;;  %vm330_vm9 = vcmp.ge.f32.partialorder %v850_v15, 0.0 }
  0x4a   : > { %vm362_vm2 = vcmp.ge.f32.partialorder %v857_v2, 0.0  ;;  %v865_v3 = vld [vmem:[%s1263_s25 + $0xc0] sm:$0xff]  ;;  %v337_v6 = vsel %vm329_vm1, %v849_v1, 4.0  ;;  %v866_v20 = vld [vmem:[%s1263_s25 + $0xc8] sm:$0xff]  ;;  %vm363_vm10 = vcmp.ge.f32.partialorder %v858_v16, 0.0  ;;  %v338_v27 = vsel %vm330_vm9, %v850_v15, 4.0 }
  0x4b   : > { %v873_v4 = vld [vmem:[%s1263_s25 + $0x100] sm:$0xff]  ;;  %v370_v7 = vsel %vm362_vm2, %v857_v2, 4.0  ;;  %vm395_vm3 = vcmp.ge.f32.partialorder %v865_v3, 0.0  ;;  %v345_v10 = vmin.f32 %v312_v5, %v337_v6  ;;  %v874_v21 = vld [vmem:[%s1263_s25 + $0x108] sm:$0xff]  ;;  %vm396_vm11 = vcmp.ge.f32.partialorder %v866_v20, 0.0  ;;  %v859_v37 = vld [vmem:[%s1263_s25 + $0x90] sm:$0xff] }
  0x4c   : > { %v881_v8 = vld [vmem:[%s1263_s25 + $0x140] sm:$0xff]  ;;  %vm428_vm4 = vcmp.ge.f32.partialorder %v873_v4, 0.0  ;;  %v403_v13 = vsel %vm395_vm3, %v865_v3, 4.0  ;;  %v882_v22 = vld [vmem:[%s1263_s25 + $0x148] sm:$0xff]  ;;  %v371_v28 = vsel %vm363_vm10, %v858_v16, 4.0  ;;  %v346_v31 = vmin.f32 %v313_v23, %v338_v27  ;;  %v867_v38 = vld [vmem:[%s1263_s25 + $0xd0] sm:$0xff] }
  0x4d   : > { %v889_v9 = vld [vmem:[%s1263_s25 + $0x180] sm:$0xff]  ;;  %vm461_vm5 = vcmp.ge.f32.partialorder %v881_v8, 0.0  ;;  %v436_v14 = vsel %vm428_vm4, %v873_v4, 4.0  ;;  %v378_v17 = vmin.f32 %v345_v10, %v370_v7  ;;  %v890_v24 = vld [vmem:[%s1263_s25 + $0x188] sm:$0xff]  ;;  %vm429_vm12 = vcmp.ge.f32.partialorder %v874_v21, 0.0  ;;  %v875_v41 = vld [vmem:[%s1263_s25 + $0x110] sm:$0xff] }
  0x4e   : > { %v897_v11 = vld [vmem:[%s1263_s25 + $0x1c0] sm:$0xff]  ;;  %vm494_vm6 = vcmp.ge.f32.partialorder %v889_v9, 0.0  ;;  %v469_v18 = vsel %vm461_vm5, %v881_v8, 4.0  ;;  %vm462_vm13 = vcmp.ge.f32.partialorder %v882_v22, 0.0  ;;  %vm495_vm14 = vcmp.ge.f32.partialorder %v890_v24, 0.0  ;;  %v898_v32 = vld [vmem:[%s1263_s25 + $0x1c8] sm:$0xff] }
  0x4f   : > { %vm527_vm7 = vcmp.ge.f32.partialorder %v897_v11, 0.0  ;;  %v502_v19 = vsel %vm494_vm6, %v889_v9, 4.0  ;;  %v411_v25 = vmin.f32 %v378_v17, %v403_v13  ;;  %v404_v34 = vsel %vm396_vm11, %v866_v20, 4.0  ;;  %v883_v45 = vld [vmem:[%s1263_s25 + $0x150] sm:$0xff]  ;;  %v299_v56 = vld [vmem:[%s1263_s25 + $0x18] sm:$0xff]  ;;  %s1304_s29 = scalar_lea.vmem [#allocation7], %s844_s26 }
  0x50   : > { %v535_v26 = vsel %vm527_vm7, %v897_v11, 4.0  ;;  %v437_v35 = vsel %vm429_vm12, %v874_v21, 4.0  ;;  %v470_v36 = vsel %vm462_vm13, %v882_v22, 4.0  ;;  %v379_v39 = vmin.f32 %v346_v31, %v371_v28  ;;  %v891_v48 = vld [vmem:[%s1263_s25 + $0x190] sm:$0xff]  ;;  %v852_v57 = vld [vmem:[%s1263_s25 + $0x58] sm:$0xff]  ;;  %v300_v15 = vld [vmem:[%s1263_s25 + $0x20] sm:$0xff] }
  0x51   : > { %v444_v33 = vmin.f32 %v411_v25, %v436_v14  ;;  %v503_v40 = vsel %vm495_vm14, %v890_v24, 4.0  ;;  %vm331_vm0 = vcmp.ge.f32.partialorder %v851_v30, 0.0  ;;  %vm528_vm1 = vcmp.ge.f32.partialorder %v898_v32, 0.0  ;;  %v899_v52 = vld [vmem:[%s1263_s25 + $0x1d0] sm:$0xff]  ;;  %v860_v58 = vld [vmem:[%s1263_s25 + $0x98] sm:$0xff]  ;;  %v861_v22 = vld [vmem:[%s1263_s25 + $0xa0] sm:$0xff] }
  0x52   : > { %v314_v43 = vsel %vm306_vm15, %v298_v29, 4.0  ;;  %v339_v44 = vsel %vm331_vm0, %v851_v30, 4.0  ;;  %v412_v46 = vmin.f32 %v379_v39, %v404_v34  ;;  %vm364_vm2 = vcmp.ge.f32.partialorder %v859_v37, 0.0  ;;  %v868_v1 = vld [vmem:[%s1263_s25 + $0xd8] sm:$0xff]  ;;  %v869_v23 = vld [vmem:[%s1263_s25 + $0xe0] sm:$0xff]  ;;  %p1334_p4 = scmp.lt.s32.totalorder %s846_s14, 7 }
  0x53   : > { %v477_v42 = vmin.f32 %v444_v33, %v469_v18  ;;  %v347_v47 = vmin.f32 %v314_v43, %v339_v44  ;;  %vm397_vm3 = vcmp.ge.f32.partialorder %v867_v38, 0.0  ;;  %v372_v50 = vsel %vm364_vm2, %v859_v37, 4.0  ;;  %v876_v2 = vld [vmem:[%s1263_s25 + $0x118] sm:$0xff]  ;;  %v877_v24 = vld [vmem:[%s1263_s25 + $0x120] sm:$0xff]  ;;  %v854_v37 = vld [vmem:[%s1263_s25 + $0x68] sm:$0xff]  ;;  %s1363_s6 = sld [smem:[#allocation2]] }
  0x54   : > { %v405_v51 = vsel %vm397_vm3, %v867_v38, 4.0  ;;  %vm430_vm4 = vcmp.ge.f32.partialorder %v875_v41, 0.0  ;;  %v445_v53 = vmin.f32 %v412_v46, %v437_v35  ;;  %v536_v54 = vsel %vm528_vm1, %v898_v32, 4.0  ;;  %v884_v7 = vld [vmem:[%s1263_s25 + $0x158] sm:$0xff]  ;;  %v885_v30 = vld [vmem:[%s1263_s25 + $0x160] sm:$0xff]  ;;  %v862_v46 = vld [vmem:[%s1263_s25 + $0xa8] sm:$0xff] }
  0x55   : > { %v510_v49 = vmin.f32 %v477_v42, %v502_v19  ;;  %v380_v55 = vmin.f32 %v347_v47, %v372_v50  ;;  %vm463_vm5 = vcmp.ge.f32.partialorder %v883_v45, 0.0  ;;  %v438_v60 = vsel %vm430_vm4, %v875_v41, 4.0  ;;  %v892_v10 = vld [vmem:[%s1263_s25 + $0x198] sm:$0xff]  ;;  %v853_v19 = vld [vmem:[%s1263_s25 + $0x60] sm:$0xff]  ;;  %v870_v47 = vld [vmem:[%s1263_s25 + $0xe8] sm:$0xff]  ;;  %s1709_s14 = smov (!%p1334_p4, %s846_s14), 7 }
  0x56   : > { %v471_v61 = vsel %vm463_vm5, %v883_v45, 4.0  ;;  %vm496_vm6 = vcmp.ge.f32.partialorder %v891_v48, 0.0  ;;  %v478_v62 = vmin.f32 %v445_v53, %v470_v36  ;;  %vm529_vm7 = vcmp.ge.f32.partialorder %v899_v52, 0.0  ;;  %v900_v14 = vld [vmem:[%s1263_s25 + $0x1d8] sm:$0xff]  ;;  %v893_v35 = vld [vmem:[%s1263_s25 + $0x1a0] sm:$0xff]  ;;  %v301_v36 = vld [vmem:[%s1263_s25 + $0x28] sm:$0xff] }
  0x57   : > { %v543_v59 = vmin.f32 %v510_v49, %v535_v26  ;;  %v413_v63 = vmin.f32 %v380_v55, %v405_v51  ;;  %v504_v0 = vsel %vm496_vm6, %v891_v48, 4.0  ;;  %vm307_vm9 = vcmp.ge.f32.partialorder %v299_v56, 0.0  ;;  %v901_v41 = vld [vmem:[%s1263_s25 + $0x1e0] sm:$0xff]  ;;  %v878_v48 = vld [vmem:[%s1263_s25 + $0x128] sm:$0xff]  ;;  %s920_s5 = sshll.u32 %s1709_s14, 4  ;;  %s1367_s7 = sld [smem:[#allocation2 + $0x1]] }
  0x58   : > { %vm332_vm10 = vcmp.ge.f32.partialorder %v852_v57, 0.0  ;;  %vm365_vm11 = vcmp.ge.f32.partialorder %v860_v58, 0.0  ;;  %v511_v4 = vmin.f32 %v478_v62, %v503_v40  ;;  %v315_v6 = vsel %vm307_vm9, %v299_v56, 4.0  ;;  %v886_v53 = vld [vmem:[%s1263_s25 + $0x168] sm:$0xff]  ;;  %s1374_s11 = scalar_lea.vmem %s1659_s2, %s920_s5  ;;  %s686_s12 = sshll.u32 %s1304_s29, 4  ;;  %s1435_s12 = int_to_ptr.vmem [resolvable:$true] %s686_s12 }
  0x59   : > { %vm551_vm8 = vcmp.ne.f32.partialorder %v543_v59, 4.0  ;;  %v446_v5 = vmin.f32 %v413_v63, %v438_v60  ;;  %v340_v8 = vsel %vm332_vm10, %v852_v57, 4.0  ;;  %v373_v9 = vsel %vm365_vm11, %v860_v58, 4.0  ;;  %v302_v60 = vld [vmem:[%s1263_s25 + $0x30] sm:$0xff]  ;;  %s922_s13 = sshll.u32 %s1178_s19, 10  ;;  %s845_s20 = sshll.u32 %s1259_s22, 5 }
  0x5a   : > { %v559_v3 = vsel %vm551_vm8, %v543_v59, 0.0  ;;  %vm398_vm12 = vcmp.ge.f32.partialorder %v868_v1, 0.0  ;;  %vm431_vm13 = vcmp.ge.f32.partialorder %v876_v2, 0.0  ;;  %v544_v11 = vmin.f32 %v511_v4, %v536_v54  ;;  %v894_v59 = vld [vmem:[%s1263_s25 + $0x1a8] sm:$0xff]  ;;  %s1482_s26 = sld [smem:[#allocation2 + $0x2]]  ;;  %s1014_s14 = scalar_lea.vmem %s1435_s12, 1024 }
  0x5b   : > { %567 = vst [vmem:[%s1304_s29] sm:$0xff] %v559_v3  ;;  %v479_v12 = vmin.f32 %v446_v5, %v471_v61  ;;  %v348_v13 = vmin.f32 %v315_v6, %v340_v8  ;;  %v537_v16 = vsel %vm529_vm7, %v899_v52, 4.0  ;;  %v406_v17 = vsel %vm398_vm12, %v868_v1, 4.0  ;;  %v855_v1 = vld [vmem:[%s1263_s25 + $0x70] sm:$0xff]  ;;  %p1015_p11 = scmp.ne.s32.totalorder %s1435_s12, %s1014_s14  ;;  %p1692_p12 = scmp.ne.s32.totalorder %s1677_s27, 0 }
  0x5c   : > { %v439_v18 = vsel %vm431_vm13, %v876_v2, 4.0  ;;  %vm464_vm14 = vcmp.ge.f32.partialorder %v884_v7, 0.0  ;;  %vm552_vm15 = vcmp.ne.f32.partialorder %v544_v11, 4.0  ;;  %vm497_vm0 = vcmp.ge.f32.partialorder %v892_v10, 0.0  ;;  %v863_v5 = vld [vmem:[%s1263_s25 + $0xb0] sm:$0xff]  ;;  %s1126_s23 = smov [#allocation7]  }
  0x5d   : > { %v512_v20 = vmin.f32 %v479_v12, %v504_v0  ;;  %v381_v21 = vmin.f32 %v348_v13, %v373_v9  ;;  %v560_v25 = vsel %vm552_vm15, %v544_v11, 0.0  ;;  %v472_v26 = vsel %vm464_vm14, %v884_v7, 4.0  ;;  %v902_v0 = vld [vmem:[%s1263_s25 + $0x1e8] sm:$0xff]  ;;  %v871_v6 = vld [vmem:[%s1263_s25 + $0xf0] sm:$0xff]  ;;  %p1016_p13 = pnand %p1015_p11, %p1692_p12  ;;  %s1018_s5 = sshll.u32 %s1126_s23, 4  ;;  %s1019_s5 = int_to_ptr.vmem [resolvable:$false] %s1018_s5 }
  0x5e   : > { %vm530_vm1 = vcmp.ge.f32.partialorder %v900_v14, 0.0  ;;  %vm308_vm2 = vcmp.ge.f32.partialorder %v300_v15, 0.0  ;;  %568 = vst [vmem:[%s1304_s29 + $0x8] sm:$0xff] %v560_v25  ;;  %vm333_vm3 = vcmp.ge.f32.partialorder %v853_v19, 0.0  ;;  %vm366_vm4 = vcmp.ge.f32.partialorder %v861_v22, 0.0  ;;  %v879_v7 = vld [vmem:[%s1263_s25 + $0x130] sm:$0xff]  ;;  %p1021_p0 = scmp.lt.s32.totalorder %s1435_s12, %s1019_s5 }
  0x5f   : > { %v545_v27 = vmin.f32 %v512_v20, %v537_v16  ;;  %v414_v28 = vmin.f32 %v381_v21, %v406_v17  ;;  %v316_v29 = vsel %vm308_vm2, %v300_v15, 4.0  ;;  %v341_v31 = vsel %vm333_vm3, %v853_v19, 4.0  ;;  %v887_v13 = vld [vmem:[%s1263_s25 + $0x170] sm:$0xff]  ;;  %v303_v21 = vld [vmem:[%s1263_s25 + $0x38] sm:$0xff]  ;;  %p1017_p1 = pneg %p1016_p13 }
  0x60   : > { %vm399_vm5 = vcmp.ge.f32.partialorder %v869_v23, 0.0  ;;  %vm432_vm6 = vcmp.ge.f32.partialorder %v877_v24, 0.0  ;;  %v349_v33 = vmin.f32 %v316_v29, %v341_v31  ;;  %v374_v34 = vsel %vm366_vm4, %v861_v22, 4.0  ;;  %v895_v20 = vld [vmem:[%s1263_s25 + $0x1b0] sm:$0xff]  ;;  %v856_v22 = vld [vmem:[%s1263_s25 + $0x78] sm:$0xff] }
  0x61   : > { %vm553_vm7 = vcmp.ne.f32.partialorder %v545_v27, 4.0  ;;  %v447_v32 = vmin.f32 %v414_v28, %v439_v18  ;;  %v505_v39 = vsel %vm497_vm0, %v892_v10, 4.0  ;;  %v407_v40 = vsel %vm399_vm5, %v869_v23, 4.0 }
  0x62   : > { %v561_v38 = vsel %vm553_vm7, %v545_v27, 0.0  ;;  %vm465_vm8 = vcmp.ge.f32.partialorder %v885_v30, 0.0  ;;  %v538_v43 = vsel %vm530_vm1, %v900_v14, 4.0  ;;  %v382_v44 = vmin.f32 %v349_v33, %v374_v34  ;;  %v864_v27 = vld [vmem:[%s1263_s25 + $0xb8] sm:$0xff] }
  0x63   : > { %569 = vst [vmem:[%s1304_s29 + $0x10] sm:$0xff] %v561_v38  ;;  %v480_v42 = vmin.f32 %v447_v32, %v472_v26  ;;  %v440_v45 = vsel %vm432_vm6, %v877_v24, 4.0  ;;  %v473_v49 = vsel %vm465_vm8, %v885_v30, 4.0  ;;  %vm498_vm9 = vcmp.ge.f32.partialorder %v893_v35, 0.0  ;;  %v903_v26 = vld [vmem:[%s1263_s25 + $0x1f0] sm:$0xff]  ;;  %v872_v32 = vld [vmem:[%s1263_s25 + $0xf8] sm:$0xff] }
  0x64   : > { %vm309_vm10 = vcmp.ge.f32.partialorder %v301_v36, 0.0  ;;  %vm334_vm11 = vcmp.ge.f32.partialorder %v854_v37, 0.0  ;;  %v415_v51 = vmin.f32 %v382_v44, %v407_v40  ;;  %vm531_vm12 = vcmp.ge.f32.partialorder %v901_v41, 0.0  ;;  %v880_v34 = vld [vmem:[%s1263_s25 + $0x138] sm:$0xff] }
  0x65   : > { %v513_v50 = vmin.f32 %v480_v42, %v505_v39  ;;  %v317_v52 = vsel %vm309_vm10, %v301_v36, 4.0  ;;  %v342_v54 = vsel %vm334_vm11, %v854_v37, 4.0  ;;  %vm367_vm13 = vcmp.ge.f32.partialorder %v862_v46, 0.0  ;;  %v888_v38 = vld [vmem:[%s1263_s25 + $0x178] sm:$0xff] }
  0x66   : > { %vm400_vm14 = vcmp.ge.f32.partialorder %v870_v47, 0.0  ;;  %vm433_vm15 = vcmp.ge.f32.partialorder %v878_v48, 0.0  ;;  %v448_v56 = vmin.f32 %v415_v51, %v440_v45  ;;  %v350_v57 = vmin.f32 %v317_v52, %v342_v54  ;;  %v896_v42 = vld [vmem:[%s1263_s25 + $0x1b8] sm:$0xff]  ;;  %v1383_v54 = vld [vmem:[%s1374_s11 + $0x10] sm:$0xff] }
  0x67   : > { %v546_v55 = vmin.f32 %v513_v50, %v538_v43  ;;  %v375_v58 = vsel %vm367_vm13, %v862_v46, 4.0  ;;  %v506_v61 = vsel %vm498_vm9, %v893_v35, 4.0  ;;  %v539_v62 = vsel %vm531_vm12, %v901_v41, 4.0 }
  0x68   : > { %v408_v63 = vsel %vm400_vm14, %v870_v47, 4.0  ;;  %vm466_vm0 = vcmp.ge.f32.partialorder %v886_v53, 0.0  ;;  %v481_v2 = vmin.f32 %v448_v56, %v473_v49  ;;  %v383_v3 = vmin.f32 %v350_v57, %v375_v58  ;;  %v904_v47 = vld [vmem:[%s1263_s25 + $0x1f8] sm:$0xff]  ;;  %v1389_v58 = vld [vmem:[%s1374_s11 + $0x30] sm:$0xff]  ;;  %s1456_s25 = scalar_lea.hbm %s1660_s3, %s922_s13 }
  0x69   : > { %vm554_vm1 = vcmp.ne.f32.partialorder %v546_v55, 4.0  ;;  %v441_v4 = vsel %vm433_vm15, %v878_v48, 4.0  ;;  %v474_v9 = vsel %vm466_vm0, %v886_v53, 4.0  ;;  %vm499_vm2 = vcmp.ge.f32.partialorder %v894_v59, 0.0  ;;  %v1380_v53 = vld [vmem:[%s1374_s11] sm:$0xff] }
  0x6a   : > { %v562_v8 = vsel %vm554_vm1, %v546_v55, 0.0  ;;  %vm310_vm3 = vcmp.ge.f32.partialorder %v302_v60, 0.0  ;;  %v514_v10 = vmin.f32 %v481_v2, %v506_v61  ;;  %v416_v11 = vmin.f32 %v383_v3, %v408_v63  ;;  %v1386_v55 = vld [vmem:[%s1374_s11 + $0x20] sm:$0xff] }
  0x6b   : > { %570 = vst [vmem:[%s1304_s29 + $0x18] sm:$0xff] %v562_v8  ;;  %vm532_vm4 = vcmp.ge.f32.partialorder %v902_v0, 0.0  ;;  %v318_v12 = vsel %vm310_vm3, %v302_v60, 4.0  ;;  %vm335_vm5 = vcmp.ge.f32.partialorder %v855_v1, 0.0  ;;  %vm368_vm6 = vcmp.ge.f32.partialorder %v863_v5, 0.0  ;;  %v1451_v8 = vld [vmem:[%s1374_s11 + $0x8] sm:$0xff] }
  0x6c   : > { %vm401_vm7 = vcmp.ge.f32.partialorder %v871_v6, 0.0  ;;  %vm434_vm8 = vcmp.ge.f32.partialorder %v879_v7, 0.0  ;;  %v547_v14 = vmin.f32 %v514_v10, %v539_v62  ;;  %v449_v15 = vmin.f32 %v416_v11, %v441_v4  ;;  %v1463_v10 = vld [vmem:[%s1374_s11 + $0x18] sm:$0xff] }
  0x6d   : > { %v343_v16 = vsel %vm335_vm5, %v855_v1, 4.0  ;;  %v376_v17 = vsel %vm368_vm6, %v863_v5, 4.0  ;;  %v507_v18 = vsel %vm499_vm2, %v894_v59, 4.0  ;;  %vm467_vm9 = vcmp.ge.f32.partialorder %v887_v13, 0.0 }
  0x6e   : > { %v351_v19 = vmin.f32 %v318_v12, %v343_v16  ;;  %vm555_vm10 = vcmp.ne.f32.partialorder %v547_v14, 4.0  ;;  %v482_v23 = vmin.f32 %v449_v15, %v474_v9  ;;  %v540_v24 = vsel %vm532_vm4, %v902_v0, 4.0 }
  0x6f   : > { %v409_v25 = vsel %vm401_vm7, %v871_v6, 4.0  ;;  %v563_v28 = vsel %vm555_vm10, %v547_v14, 0.0  ;;  %v442_v30 = vsel %vm434_vm8, %v879_v7, 4.0  ;;  %v475_v31 = vsel %vm467_vm9, %v887_v13, 4.0  ;;  %v1470_v13 = vld [vmem:[%s1374_s11 + $0x28] sm:$0xff]  ;;  %v1478_v14 = vld [vmem:[%s1374_s11 + $0x38] sm:$0xff] }
  0x70   : > { %v384_v29 = vmin.f32 %v351_v19, %v376_v17  ;;  %571 = vst [vmem:[%s1304_s29 + $0x20] sm:$0xff] %v563_v28  ;;  %v515_v33 = vmin.f32 %v482_v23, %v507_v18  ;;  %vm500_vm11 = vcmp.ge.f32.partialorder %v895_v20, 0.0  ;;  %vm311_vm12 = vcmp.ge.f32.partialorder %v303_v21, 0.0 }
  0x71   : > { %vm336_vm13 = vcmp.ge.f32.partialorder %v856_v22, 0.0  ;;  %v319_v36 = vsel %vm311_vm12, %v303_v21, 4.0  ;;  %vm369_vm14 = vcmp.ge.f32.partialorder %v864_v27, 0.0  ;;  %vm402_vm15 = vcmp.ge.f32.partialorder %v872_v32, 0.0 }
  0x72   : > { %v417_v35 = vmin.f32 %v384_v29, %v409_v25  ;;  %v344_v37 = vsel %vm336_vm13, %v856_v22, 4.0  ;;  %v548_v39 = vmin.f32 %v515_v33, %v540_v24  ;;  %v377_v41 = vsel %vm369_vm14, %v864_v27, 4.0 }
  0x73   : > { %v352_v40 = vmin.f32 %v319_v36, %v344_v37  ;;  %vm533_vm0 = vcmp.ge.f32.partialorder %v903_v26, 0.0  ;;  %v410_v44 = vsel %vm402_vm15, %v872_v32, 4.0  ;;  %vm435_vm1 = vcmp.ge.f32.partialorder %v880_v34, 0.0 }
  0x74   : > { %v450_v43 = vmin.f32 %v417_v35, %v442_v30  ;;  %vm556_vm2 = vcmp.ne.f32.partialorder %v548_v39, 4.0  ;;  %v508_v45 = vsel %vm500_vm11, %v895_v20, 4.0  ;;  %vm468_vm3 = vcmp.ge.f32.partialorder %v888_v38, 0.0 }
  0x75   : > { %v385_v46 = vmin.f32 %v352_v40, %v377_v41  ;;  %v564_v48 = vsel %vm556_vm2, %v548_v39, 0.0  ;;  %v443_v50 = vsel %vm435_vm1, %v880_v34, 4.0  ;;  %vm501_vm4 = vcmp.ge.f32.partialorder %v896_v42, 0.0 }
  0x76   : > { %v483_v49 = vmin.f32 %v450_v43, %v475_v31  ;;  %572 = vst [vmem:[%s1304_s29 + $0x28] sm:$0xff] %v564_v48  ;;  %v541_v51 = vsel %vm533_vm0, %v903_v26, 4.0  ;;  %v476_v57 = vsel %vm468_vm3, %v888_v38, 4.0  ;;  %vm534_vm5 = vcmp.ge.f32.partialorder %v904_v47, 0.0 }
  0x77   : > { %v418_v52 = vmin.f32 %v385_v46, %v410_v44  ;;  %v509_v60 = vsel %vm501_vm4, %v896_v42, 4.0  ;;  %v1392_v61 = vstv %s1363_s6  ;;  %v1395_v62 = vstv %s1367_s7  ;;  %s1020_s6 = scalar_lea.vmem %s1019_s5, 2048 }
  0x78   : > { %v516_v56 = vmin.f32 %v483_v49, %v508_v45  ;;  %vm1669_vm6 = vcmp.ge.s32.totalorder %v1380_v53, %v1395_v62  ;;  %vm1668_vm7 = vcmp.ge.s32.totalorder %v1383_v54, %v1395_v62  ;;  %vm1667_vm8 = vcmp.ge.s32.totalorder %v1386_v55, %v1395_v62  ;;  %p1022_p2 = scmp.lt.s32.totalorder %s1020_s6, %s1014_s14 }
  0x79   : > { %v451_v59 = vmin.f32 %v418_v52, %v443_v50  ;;  %vm1666_vm9 = vcmp.ge.s32.totalorder %v1389_v58, %v1395_v62  ;;  %vm1671_vm10 = vmmov 1   ;;  %v542_v2 = vsel %vm534_vm5, %v904_v47, 4.0 }
  0x7a   : > { %v549_v63 = vmin.f32 %v516_v56, %v541_v51  ;;  %vm1409_vm11 = vmxor %vm1669_vm6, %vm1671_vm10  ;;  %vm585_vm13 = vcmp.ge.s32.totalorder %v1380_v53, %v1392_v61  ;;  %vm587_vm15 = vcmp.ge.s32.totalorder %v1383_v54, %v1392_v61  ;;  %vm589_vm1 = vcmp.ge.s32.totalorder %v1386_v55, %v1392_v61  ;;  %p1023_p3 = por %p1022_p2, %p1021_p0 }
  0x7b   : > { %v484_v0 = vmin.f32 %v451_v59, %v476_v57  ;;  %vm605_vm14 = vmxor %vm1668_vm7, %vm1671_vm10  ;;  %vm591_vm3 = vcmp.ge.s32.totalorder %v1389_v58, %v1392_v61 }
  0x7c   : > { %vm557_vm12 = vcmp.ne.f32.partialorder %v549_v63, 4.0  ;;  %vm607_vm0 = vmxor %vm1667_vm8, %vm1671_vm10  ;;  %p1024_p7 = pnand %p1023_p3, %p1017_p1 }
  0x7d   : > { %v565_v3 = vsel %vm557_vm12, %v549_v63, 0.0  ;;  %v517_v4 = vmin.f32 %v484_v0, %v509_v60  ;;  %vm609_vm2 = vmxor %vm1666_vm9, %vm1671_vm10 }
  0x7e   : > { %573 = vst [vmem:[%s1304_s29 + $0x30] sm:$0xff] %v565_v3  ;;  %vm1442_vm4 = vmand %vm585_vm13, %vm1409_vm11 }
  0x7f   : > { %v550_v5 = vmin.f32 %v517_v4, %v542_v2  ;;  %vm1446_vm5 = vmand %vm587_vm15, %vm605_vm14  ;;  %vm1665_vm15 = vcmp.ge.s32.totalorder %v1451_v8, %v1395_v62 }
  0x80   : > { %vm1458_vm11 = vmand %vm589_vm1, %vm607_vm0  ;;  %vm1664_vm1 = vcmp.ge.s32.totalorder %v1463_v10, %v1395_v62 }
  0x81   : > { %vm558_vm12 = vcmp.ne.f32.partialorder %v550_v5, 4.0  ;;  %vm1465_vm13 = vmand %vm591_vm3, %vm609_vm2 }
  0x82   : > { %v566_v11 = vsel %vm558_vm12, %v550_v5, 0.0  ;;  %vm619_vm14 = vmpackc.low %vm1446_vm5, %vm1442_vm4 }
  0x83   : > { %574 = vst [vmem:[%s1304_s29 + $0x38] sm:$0xff] %v566_v11  ;;  %vm620_vm0 = vmpackc.low %vm1465_vm13, %vm1458_vm11  ;;  %s667_s29 = scalar_lea.sflag [#allocation4], %s1259_s22 }
  0x84   : > { %1027 = shalt.err (!%p1024_p7)
}
  0x85   : > { %s1028_s7 = scalar_lea.hbm %s1456_s25, 1024  ;;  %s1032_s11 = scalar_lea.hbm %s1660_s3, 2048 }
  0x86   : > { %p1029_p8 = scmp.ne.s32.totalorder %s1456_s25, %s1028_s7  ;;  %p1033_p5 = scmp.lt.u32.totalorder %s1456_s25, %s1660_s3 }
  0x87   : > { %p1034_p4 = scmp.lt.u32.totalorder %s1032_s11, %s1028_s7  ;;  %p1036_p13 = scmp.lt.u32.totalorder %s1028_s7, %s1456_s25 }
  0x88   : > { %p1030_p9 = pnand %p1029_p8, %p1692_p12 }
  0x89   : > { %p1035_p11 = por %p1034_p4, %p1033_p5 }
  0x8a   : > { %p1031_p10 = pneg %p1030_p9 }
  0x8b   : > { %p1037_p1 = por %p1036_p13, %p1035_p11 }
  0x8d   : > { %p1038_p0 = pnand %p1037_p1, %p1031_p10 }
  0x8f   : > { %1041 = shalt.err (!%p1038_p0)
}
  0x90   : > { %s1127_s30 = smov 256   ;;  %s1128_s14 = smov 16   ;;  %vm621_vm2 = vmpackc.even %vm620_vm0, %vm619_vm14  ;;  %vm1670_vm3 = vcmp.ge.s32.totalorder %v1470_v13, %v1395_v62  ;;  %v1129_v15 = vmov 0   ;;  %vm1673_vm12 = vcmp.ge.s32.totalorder %v1478_v14, %v1395_v62  ;;  %vm586_vm5 = vcmp.ge.s32.totalorder %v1451_v8, %v1392_v61 }
  0x91   : > { %937 = dma.vmem_to_hbm [thread:$0]  (%p1692_p12), %s1435_s12, 1024, %s1456_s25, %s667_s29, %s1127_s30, %s1127_s30, %s1128_s14   ;;  %v625_v16 = vsel %vm621_vm2, 16843009, %v1129_v15  ;;  %vm604_vm4 = vmxor %vm1665_vm15, %vm1671_vm10  ;;  %vm588_vm13 = vcmp.ge.s32.totalorder %v1463_v10, %v1392_v61  ;;  %vm590_vm0 = vcmp.ge.s32.totalorder %v1470_v13, %v1392_v61 }
  0x92   : > { %s1537_s12 = scalar_lea.vmem [#allocation8], %s845_s20  ;;  %vm606_vm11 = vmxor %vm1664_vm1, %vm1671_vm10  ;;  %vm592_vm1 = vcmp.ge.s32.totalorder %v1478_v14, %v1392_v61  ;;  %v630_v17 = vstv %s1482_s26  ;;  %s923_s25 = sshll.u32 %s1178_s19, 8 }
  0x93   : > { %627 = vst [vmem:[%s1537_s12] sm:$0xff] %v625_v16  ;;  %vm608_vm14 = vmxor %vm1670_vm3, %vm1671_vm10  ;;  %vm631_vm3 = vcmp.ge.s32.totalorder %v1380_v53, %v630_v17  ;;  %s702_s20 = sshll.u32 %s1537_s12, 4  ;;  %s1610_s23 = scalar_lea.hbm %s1661_s4, %s923_s25  ;;  %s1605_s20 = int_to_ptr.vmem [resolvable:$true] %s702_s20 }
  0x94   : > { %vm610_vm2 = vmxor %vm1673_vm12, %vm1671_vm10  ;;  %vm633_vm12 = vcmp.ge.s32.totalorder %v1383_v54, %v630_v17  ;;  %s672_s5 = scalar_lea.sflag [#allocation9], %s1259_s22  ;;  %s1042_s6 = scalar_lea.vmem %s1605_s20, 512 }
  0x95   : > { %vm612_vm15 = vmand %vm586_vm5, %vm604_vm4  ;;  %vm635_vm5 = vcmp.ge.s32.totalorder %v1386_v55, %v630_v17  ;;  %p1043_p2 = scmp.ne.s32.totalorder %s1605_s20, %s1042_s6  ;;  %s1130_s19 = smov [#allocation8]  }
  0x96   : > { %vm614_vm9 = vmand %vm588_vm13, %vm606_vm11  ;;  %vm637_vm11 = vcmp.ge.s32.totalorder %v1389_v58, %v630_v17  ;;  %vm1693_vm13 = vmmov 1   ;;  %s1046_s7 = sshll.u32 %s1130_s19, 4  ;;  %s1047_s7 = int_to_ptr.vmem [resolvable:$false] %s1046_s7 }
  0x97   : > { %vm616_vm8 = vmand %vm590_vm0, %vm608_vm14  ;;  %p1044_p3 = pnand %p1043_p2, %p1692_p12  ;;  %s1048_s8 = scalar_lea.vmem %s1047_s7, 1024 }
  0x98   : > { %vm618_vm7 = vmand %vm592_vm1, %vm610_vm2  ;;  %p1049_p8 = scmp.lt.s32.totalorder %s1605_s20, %s1047_s7  ;;  %p1050_p9 = scmp.lt.s32.totalorder %s1048_s8, %s1042_s6 }
  0x99   : > { %vm622_vm6 = vmpackc.low %vm614_vm9, %vm612_vm15  ;;  %vm1696_vm15 = vcmp.ge.s32.totalorder %v1386_v55, %v1395_v62  ;;  %p1045_p7 = pneg %p1044_p3 }
  0x9a   : > { %vm623_vm10 = vmpackc.low %vm618_vm7, %vm616_vm8  ;;  %vm1694_vm7 = vcmp.ge.s32.totalorder %v1380_v53, %v1395_v62  ;;  %p1051_p10 = por %p1050_p9, %p1049_p8 }
  0x9b   : > { %vm624_vm4 = vmpackc.even %vm623_vm10, %vm622_vm6  ;;  %vm1695_vm6 = vcmp.ge.s32.totalorder %v1383_v54, %v1395_v62 }
  0x9c   : > { %v626_v18 = vsel %vm624_vm4, 16843009, %v1129_v15  ;;  %vm639_vm0 = vmxor %vm631_vm3, %vm1693_vm13  ;;  %p1052_p5 = pnand %p1051_p10, %p1045_p7 }
  0x9d   : > { %628 = vst [vmem:[%s1537_s12 + $0x8] sm:$0xff] %v626_v18  ;;  %vm641_vm14 = vmxor %vm633_vm12, %vm1693_vm13  ;;  %vm1697_vm12 = vcmp.ge.s32.totalorder %v1389_v58, %v1395_v62 }
  0x9e   : > { %vm643_vm1 = vmxor %vm635_vm5, %vm1693_vm13  ;;  %vm632_vm5 = vcmp.ge.s32.totalorder %v1451_v8, %v630_v17 }
  0x9f   : > { %vm645_vm9 = vmxor %vm637_vm11, %vm1693_vm13  ;;  %vm636_vm13 = vcmp.ge.s32.totalorder %v1470_v13, %v630_v17 }
  0xa0   : > { %vm647_vm8 = vmand %vm1694_vm7, %vm639_vm0  ;;  %vm634_vm0 = vcmp.ge.s32.totalorder %v1463_v10, %v630_v17 }
  0xa1   : > { %vm649_vm10 = vmand %vm1695_vm6, %vm641_vm14  ;;  %vm638_vm14 = vcmp.ge.s32.totalorder %v1478_v14, %v630_v17  ;;  %vm1698_vm6 = vmmov 1  }
  0xa2   : > { %vm651_vm3 = vmand %vm1696_vm15, %vm643_vm1  ;;  %vm1699_vm15 = vcmp.ge.s32.totalorder %v1451_v8, %v1395_v62 }
  0xa3   : > { %vm653_vm2 = vmand %vm1697_vm12, %vm645_vm9  ;;  %vm1700_vm12 = vcmp.ge.s32.totalorder %v1463_v10, %v1395_v62 }
  0xa4   : > { %vm655_vm4 = vmpackc.low %vm649_vm10, %vm647_vm8 }
  0xa5   : > { %vm656_vm11 = vmpackc.low %vm653_vm2, %vm651_vm3 }
  0xa6   : > { %vm657_vm7 = vmpackc.even %vm656_vm11, %vm655_vm4  ;;  %vm1701_vm4 = vcmp.ge.s32.totalorder %v1470_v13, %v1395_v62  ;;  %vm1702_vm11 = vcmp.ge.s32.totalorder %v1478_v14, %v1395_v62 }
  0xa7   : > { %v661_v19 = vsel %vm657_vm7, 16843009, %v1129_v15  ;;  %vm640_vm1 = vmxor %vm632_vm5, %vm1698_vm6 }
  0xa8   : > { %907 = vst [vmem:[%s1537_s12 + $0x10] sm:$0xff] %v661_v19  ;;  %vm642_vm9 = vmxor %vm634_vm0, %vm1698_vm6 }
  0xa9   : > { %vm644_vm8 = vmxor %vm636_vm13, %vm1698_vm6 }
  0xaa   : > { %vm646_vm10 = vmxor %vm638_vm14, %vm1698_vm6 }
  0xab   : > { %vm648_vm3 = vmand %vm1699_vm15, %vm640_vm1 }
  0xac   : > { %vm650_vm2 = vmand %vm1700_vm12, %vm642_vm9 }
  0xad   : > { %vm652_vm5 = vmand %vm1701_vm4, %vm644_vm8 }
  0xae   : > { %vm654_vm13 = vmand %vm1702_vm11, %vm646_vm10 }
  0xaf   : > { %vm658_vm0 = vmpackc.low %vm650_vm2, %vm648_vm3 }
  0xb0   : > { %vm659_vm7 = vmpackc.low %vm654_vm13, %vm652_vm5 }
  0xb1   : > { %vm660_vm14 = vmpackc.even %vm659_vm7, %vm658_vm0 }
  0xb2   : > { %v662_v20 = vsel %vm660_vm14, 16843009, %v1129_v15 }
  0xb3   : > { %908 = vst [vmem:[%s1537_s12 + $0x18] sm:$0xff] %v662_v20 }
  0xb4   : > { %1055 = shalt.err (!%p1052_p5)
}
  0xb5   : > { %s1056_s10 = scalar_lea.hbm %s1610_s23, 512  ;;  %s1060_s9 = scalar_lea.hbm %s1661_s4, 1024 }
  0xb6   : > { %p1057_p4 = scmp.ne.s32.totalorder %s1610_s23, %s1056_s10  ;;  %p1061_p1 = scmp.lt.u32.totalorder %s1610_s23, %s1661_s4 }
  0xb7   : > { %p1062_p0 = scmp.lt.u32.totalorder %s1060_s9, %s1056_s10  ;;  %p1064_p3 = scmp.lt.u32.totalorder %s1056_s10, %s1610_s23 }
  0xb8   : > { %p1058_p11 = pnand %p1057_p4, %p1692_p12 }
  0xb9   : > { %p1063_p2 = por %p1062_p0, %p1061_p1 }
  0xba   : > { %p1059_p13 = pneg %p1058_p11 }
  0xbb   : > { %p1065_p7 = por %p1064_p3, %p1063_p2 }
  0xbd   : > { %p1066_p8 = pnand %p1065_p7, %p1059_p13 }
  0xbf   : > { %1069 = shalt.err (!%p1066_p8)
}
  0xc0   : > { %s1131_s26 = smov 512  }
  0xc1   : > { %938 = dma.vmem_to_hbm [thread:$0]  (%p1692_p12), %s1605_s20, 512, %s1610_s23, %s672_s5, %s1127_s30, %s1131_s26, %s1128_s14  }
  0xc2 PF: > { %s717_s29 = sand.u32 1, %s1104_s15   ;;  %p1703_p9 = scmp.ne.s32.totalorder %s1678_s28, 0 }
  0xc3   : > { %s718_s6 = scalar_lea.sflag [#allocation4], %s717_s29 }
  0xc4   : > { %p946_p10 = pnand %p834_p6, %p1703_p9 }
  0xc6   : > { %1095 = dma.done.wait (!%p946_p10), %s718_s6, 1024  }
  0xc7   : > { %1097 = vsyncadd (!%p946_p10), %s718_s6, 4294966272  ;;  %s727_s19 = scalar_lea.sflag [#allocation9], %s717_s29 }
  0xc8   : > { %1099 = dma.done.wait (!%p946_p10), %s727_s19, 512  }
  0xc9   : > { %1101 = vsyncadd (!%p946_p10), %s727_s19, 4294966784  ;;  %p22_p12 = scmp.ge.s32.totalorder %s1182_s21, 4   ;;  %s1704_s15 = smov %s1108_s16 }
  0xca   : > { %s1705_s16 = smov %s1112_s17  ;;  %s1706_s17 = smov %s1194_s24 }
  0xcb   : > { %s1707_s18 = smov %s1182_s21  ;;  %24 = sbr.rel (!%p22_p12) target bundleno = 8 (0x8), region = 115 }
  0xd2   :  { %732 = vsyncpa [#allocation3], 1 }
  0xd3   :  { %734 = vsyncpa [#allocation3 + $0x1], 1 }
  0xd4   :  { %735 = vsyncpa [#allocation4], 1 }
  0xd5   :  { %737 = vsyncpa [#allocation4 + $0x1], 1 }
  0xd6   :  { %738 = vsyncpa [#allocation9], 1 }
  0xd7   :  { %740 = vsyncpa [#allocation9 + $0x1], 1 }
  0xd8   :  { %741 = vsyncpa [#allocation5], 1 }
  0xd9   :  { %743 = vsyncpa [#allocation5 + $0x1], 1 }

</bundles_post_ra>
